<compile_context>
chip_gen: v7x
topology: tpu7x:2x2x1
jax: 0.10.0
libtpu: 0.0.40
codegen_flags: <defaults>
</compile_context>

<pallas_src>
import functools

import jax
import jax.numpy as jnp
from jax.experimental import pallas as pl
from jax.experimental.pallas import tpu as pltpu


# ------------------------------ fused kernel --------------------------------

def _resnet_block_kernel(x_ref, bn_ref, wdw1_ref, wdw2_ref, wpw_ref,
                         wca1_ref, wca2_ref, wsa_ref, o_ref,
                         pad_buf, sa_buf, *, K, pad, sa_k):
    """One batch element: x_ref (C, L) -> o_ref (C, L//2)."""
    C, L = x_ref.shape
    Lh = o_ref.shape[1]
    f32 = jnp.float32

    x = x_ref[...]                                            # (C, L)

    # ---- BN1 (eval affine) + ReLU.  Dropout(p=0.5) is identity in eval. ----
    h = jnp.maximum(x * bn_ref[:, 0:1] + bn_ref[:, 1:2], 0.0)

    def dwconv(v, w_ref):
        # depthwise Conv1d (groups=C, stride=1, 'same' pad): unrolled shifted MAC.
        pad_buf[...] = jnp.zeros_like(pad_buf)
        pad_buf[:, pad:pad + L] = v
        acc = w_ref[:, 0:1] * pad_buf[:, 0:L]
        for k in range(1, K):
            acc = acc + w_ref[:, k:k + 1] * pad_buf[:, k:k + L]
        return acc

    h = dwconv(h, wdw1_ref)                                   # depthwise_conv1
    h = jnp.maximum(h * bn_ref[:, 2:3] + bn_ref[:, 3:4], 0.0)  # BN2 + ReLU
    h = dwconv(h, wdw2_ref)                                   # depthwise_conv2

    # ---- pointwise 1x1 conv: (C, C) @ (C, L) on the MXU ----
    h = jnp.dot(wpw_ref[...], h, preferred_element_type=f32)

    # ---- MaxPool1d(2, 2) via even/odd selector matmuls ----
    rows = jax.lax.broadcasted_iota(jnp.int32, (L, Lh), 0)
    cols = jax.lax.broadcasted_iota(jnp.int32, (L, Lh), 1)
    s_even = (rows == 2 * cols).astype(f32)
    s_odd = (rows == 2 * cols + 1).astype(f32)
    h = jnp.maximum(jnp.dot(h, s_even, preferred_element_type=f32),
                    jnp.dot(h, s_odd, preferred_element_type=f32))      # (C, Lh)
    identity = jnp.maximum(jnp.dot(x, s_even, preferred_element_type=f32),
                           jnp.dot(x, s_odd, preferred_element_type=f32))

    # ---- CBAM: channel attention ----
    avg = jnp.sum(h, axis=1, keepdims=True) * (1.0 / Lh)       # (C, 1)
    mx = jnp.max(h, axis=1, keepdims=True)                     # (C, 1)
    v2 = jnp.concatenate([avg, mx], axis=1)                    # (C, 2)
    hid = jnp.maximum(jnp.dot(wca1_ref[...], v2, preferred_element_type=f32), 0.0)
    o = jnp.dot(wca2_ref[...], hid, preferred_element_type=f32)          # (C, 2)
    h = jax.nn.sigmoid(o[:, 0:1] + o[:, 1:2]) * h

    # ---- CBAM: spatial attention (Conv1d(2,1,7,pad=3), shifted MAC) ----
    ch_avg = jnp.mean(h, axis=0, keepdims=True)                # (1, Lh)
    ch_max = jnp.max(h, axis=0, keepdims=True)                 # (1, Lh)
    sp = sa_k // 2
    sa_buf[...] = jnp.zeros_like(sa_buf)
    sa_buf[0:1, sp:sp + Lh] = ch_avg
    sa_buf[1:2, sp:sp + Lh] = ch_max
    sacc = wsa_ref[:, 0:1] * sa_buf[:, 0:Lh]
    for k in range(1, sa_k):
        sacc = sacc + wsa_ref[:, k:k + 1] * sa_buf[:, k:k + Lh]
    s = sacc[0:1, :] + sacc[1:2, :]                            # (1, Lh)
    h = jax.nn.sigmoid(s) * h

    # ---- residual add (identity = MaxPool1d(2,2)(x), downsampling=True) ----
    o_ref[...] = h + identity


def resnet_1d_depthwise_block(params, x, *, kernel_size, padding, sa_kernel=7):
    N, C, L = x.shape
    assert kernel_size % 2 == 1 and padding == kernel_size // 2, \
        "only the 'same'-padding, stride=1, downsampling=True config is implemented"
    Lh = L // 2
    H = params["ca_w1"].shape[0]
    sp = sa_kernel // 2

    bn_pack = jnp.stack([params["bn1_scale"], params["bn1_shift"],
                         params["bn2_scale"], params["bn2_shift"]],
                        axis=1).astype(jnp.float32)            # (C, 4)

    kernel = functools.partial(_resnet_block_kernel,
                               K=kernel_size, pad=padding, sa_k=sa_kernel)

    return pl.pallas_call(
        kernel,
        out_shape=jax.ShapeDtypeStruct((N, C, Lh), jnp.float32),
        grid=(N,),
        in_specs=[
            pl.BlockSpec((None, C, L), lambda n: (n, 0, 0)),          # x
            pl.BlockSpec((C, 4), lambda n: (0, 0)),                   # bn params
            pl.BlockSpec((C, kernel_size), lambda n: (0, 0)),         # dw1
            pl.BlockSpec((C, kernel_size), lambda n: (0, 0)),         # dw2
            pl.BlockSpec((C, C), lambda n: (0, 0)),                   # pointwise
            pl.BlockSpec((H, C), lambda n: (0, 0)),                   # ca fc1
            pl.BlockSpec((C, H), lambda n: (0, 0)),                   # ca fc2
            pl.BlockSpec((2, sa_kernel), lambda n: (0, 0)),           # sa conv
        ],
        out_specs=pl.BlockSpec((None, C, Lh), lambda n: (n, 0, 0)),
        scratch_shapes=[
            pltpu.VMEM((C, L + 2 * padding), jnp.float32),            # conv pad buf
            pltpu.VMEM((2, Lh + 2 * sp), jnp.float32),                # sa pad buf
        ],
        compiler_params=pltpu.CompilerParams(
            dimension_semantics=("parallel",)),
    )(x, bn_pack, params["dw1_w"], params["dw2_w"], params["pw_w"],
      params["ca_w1"], params["ca_w2"], params["sa_w"])


# --------------------------- pure-JAX reference ------------------------------

def ref_forward(params, x, *, kernel_size, padding, sa_kernel=7):
    N, C, L = x.shape
    K = kernel_size
    hi = jax.lax.Precision.HIGHEST

    def bn(v, sc, sh):
        return v * sc[None, :, None] + sh[None, :, None]

    def dwconv(v, w):
        vp = jnp.pad(v, ((0, 0), (0, 0), (padding, padding)))
        return sum(w[None, :, k:k + 1] * vp[:, :, k:k + L] for k in range(K))

    def maxpool2(v):
        Lp = v.shape[2] // 2
        return jnp.maximum(v[:, :, 0:2 * Lp:2], v[:, :, 1:2 * Lp:2])

    out = jnp.maximum(bn(x, params["bn1_scale"], params["bn1_shift"]), 0.0)
    out = dwconv(out, params["dw1_w"])
    out = jnp.maximum(bn(out, params["bn2_scale"], params["bn2_shift"]), 0.0)
    out = dwconv(out, params["dw2_w"])
    out = jnp.einsum("oc,ncl->nol", params["pw_w"], out, precision=hi)
    out = maxpool2(out)
    identity = maxpool2(x)

    # channel attention
    def mlp(v):                                   # v: (N, C)
        h = jnp.maximum(jnp.einsum("nc,hc->nh", v, params["ca_w1"], precision=hi), 0.0)
        return jnp.einsum("nh,ch->nc", h, params["ca_w2"], precision=hi)
    attn = jax.nn.sigmoid(mlp(jnp.mean(out, axis=2)) + mlp(jnp.max(out, axis=2)))
    out = attn[:, :, None] * out

    # spatial attention
    Lh = out.shape[2]
    sp = sa_kernel // 2
    pooled = jnp.stack([jnp.mean(out, axis=1), jnp.max(out, axis=1)], axis=1)
    pp = jnp.pad(pooled, ((0, 0), (0, 0), (sp, sp)))
    s = sum(params["sa_w"][None, :, k:k + 1] * pp[:, :, k:k + Lh]
            for k in range(sa_kernel))
    s = jnp.sum(s, axis=1, keepdims=True)
    out = jax.nn.sigmoid(s) * out

    return out + identity


# ------------------------------ param setup ----------------------------------

def init_params(key, C, K, reduction_ratio, sa_kernel):
    H = max(1, C // reduction_ratio)
    ks = jax.random.split(key, 16)

    def u(k, shape, fan_in):
        b = 1.0 / float(fan_in) ** 0.5
        return jax.random.uniform(k, shape, jnp.float32, -b, b)

    eps = 1e-5
    p = {}
    # BatchNorm1d eval-mode affine: scale = gamma/sqrt(var+eps), shift = beta - mean*scale
    for i, name in enumerate(("bn1", "bn2")):
        g = 1.0 + 0.1 * jax.random.normal(ks[4 * i + 0], (C,), jnp.float32)
        b = 0.1 * jax.random.normal(ks[4 * i + 1], (C,), jnp.float32)
        m = 0.1 * jax.random.normal(ks[4 * i + 2], (C,), jnp.float32)
        v = 1.0 + 0.2 * jax.random.uniform(ks[4 * i + 3], (C,), jnp.float32)
        scale = g / jnp.sqrt(v + eps)
        p[name + "_scale"] = scale
        p[name + "_shift"] = b - m * scale

    p["dw1_w"] = u(ks[8], (C, K), K)                     # Conv1d(C,C,K,groups=C)
    p["dw2_w"] = u(ks[9], (C, K), K)
    p["pw_w"] = u(ks[10], (C, C), C)                     # Conv1d(C,C,1)
    p["ca_w1"] = u(ks[11], (H, C), C)                    # Linear(C, H)
    p["ca_w2"] = u(ks[12], (C, H), H)                    # Linear(H, C)
    p["sa_w"] = u(ks[13], (2, sa_kernel), 2 * sa_kernel)  # Conv1d(2,1,7)
    return p


# ---------------------------------- main --------------------------------------

if __name__ == "__main__":
    N, C, L = 2, 32, 64
    kernel_size, padding, reduction_ratio, sa_kernel = 5, 2, 16, 7

    key = jax.random.PRNGKey(0)
    k_x, k_p = jax.random.split(key)
    x = jax.random.normal(k_x, (N, C, L), jnp.float32)
    params = init_params(k_p, C, kernel_size, reduction_ratio, sa_kernel)

    fwd = jax.jit(functools.partial(resnet_1d_depthwise_block,
                                    kernel_size=kernel_size, padding=padding,
                                    sa_kernel=sa_kernel))
    out = fwd(params, x)
    jax.block_until_ready(out)

    ref = ref_forward(params, x, kernel_size=kernel_size, padding=padding,
                      sa_kernel=sa_kernel)

    assert out.shape == (N, C, L // 2), out.shape
    assert bool(jnp.all(jnp.isfinite(out)))
    max_err = float(jnp.max(jnp.abs(out - ref)))
    tol = 1e-3 + 1e-2 * float(jnp.max(jnp.abs(ref)))
    assert max_err < tol, (max_err, tol)
    print("KERNEL_OK")
</pallas_src>

<mosaic_0001>
module attributes {stable_mosaic.version = 11 : i64} {
  func.func @_resnet_block_kernel(%arg0: i32, %arg1: memref<1x32x64xf32, #tpu.memory_space<vmem>>, %arg2: memref<32x4xf32, #tpu.memory_space<vmem>>, %arg3: memref<32x5xf32, #tpu.memory_space<vmem>>, %arg4: memref<32x5xf32, #tpu.memory_space<vmem>>, %arg5: memref<32x32xf32, #tpu.memory_space<vmem>>, %arg6: memref<2x32xf32, #tpu.memory_space<vmem>>, %arg7: memref<32x2xf32, #tpu.memory_space<vmem>>, %arg8: memref<2x7xf32, #tpu.memory_space<vmem>>, %arg9: memref<1x32x32xf32, #tpu.memory_space<vmem>>, %arg10: memref<32x68xf32, #tpu.memory_space<vmem>>, %arg11: memref<2x38xf32, #tpu.memory_space<vmem>>) attributes {dimension_semantics = [#tpu.dimension_semantics<parallel>], iteration_bounds = array<i64: 2>, scalar_prefetch = 0 : i64, scratch_operands = 2 : i64, tpu.core_type = #tpu.core_type<tc>, window_params = [{transform_indices = @transform_0, window_bounds = array<i64: 1, 32, 64>}, {pipeline_mode = #tpu.pipeline_mode<synchronous>, transform_indices = @transform_1, window_bounds = array<i64: 32, 4>}, {pipeline_mode = #tpu.pipeline_mode<synchronous>, transform_indices = @transform_2, window_bounds = array<i64: 32, 5>}, {pipeline_mode = #tpu.pipeline_mode<synchronous>, transform_indices = @transform_3, window_bounds = array<i64: 32, 5>}, {pipeline_mode = #tpu.pipeline_mode<synchronous>, transform_indices = @transform_4, window_bounds = array<i64: 32, 32>}, {pipeline_mode = #tpu.pipeline_mode<synchronous>, transform_indices = @transform_5, window_bounds = array<i64: 2, 32>}, {pipeline_mode = #tpu.pipeline_mode<synchronous>, transform_indices = @transform_6, window_bounds = array<i64: 32, 2>}, {pipeline_mode = #tpu.pipeline_mode<synchronous>, transform_indices = @transform_7, window_bounds = array<i64: 2, 7>}, {transform_indices = @transform_8, window_bounds = array<i64: 1, 32, 32>}]} {
    %c0 = arith.constant 0 : index
    %c0_0 = arith.constant 0 : index
    %c0_1 = arith.constant 0 : index
    %0 = vector.load %arg1[%c0, %c0_0, %c0_1] : memref<1x32x64xf32, #tpu.memory_space<vmem>>, vector<1x32x64xf32>
    %1 = vector.shape_cast %0 : vector<1x32x64xf32> to vector<32x64xf32>
    %c0_2 = arith.constant 0 : index
    %c0_3 = arith.constant 0 : index
    %2 = vector.load %arg2[%c0_2, %c0_3] : memref<32x4xf32, #tpu.memory_space<vmem>>, vector<32x1xf32>
    %3 = vector.broadcast %2 : vector<32x1xf32> to vector<32x64xf32>
    %4 = arith.mulf %1, %3 : vector<32x64xf32>
    %c0_4 = arith.constant 0 : index
    %c1 = arith.constant 1 : index
    %5 = vector.load %arg2[%c0_4, %c1] : memref<32x4xf32, #tpu.memory_space<vmem>>, vector<32x1xf32>
    %6 = vector.broadcast %5 : vector<32x1xf32> to vector<32x64xf32>
    %7 = arith.addf %4, %6 : vector<32x64xf32>
    %cst = arith.constant 0.000000e+00 : f32
    %8 = vector.broadcast %cst : f32 to vector<32x64xf32>
    %9 = arith.maximumf %7, %8 : vector<32x64xf32>
    %cst_5 = arith.constant 0.000000e+00 : f32
    %10 = vector.broadcast %cst_5 : f32 to vector<32x68xf32>
    %c0_6 = arith.constant 0 : index
    %c0_7 = arith.constant 0 : index
    %11 = vector.load %arg10[%c0_6, %c0_7] : memref<32x68xf32, #tpu.memory_space<vmem>>, vector<32x68xf32>
    tpu.vector_store %arg10[%c0_6, %c0_7], %10 {strides = array<i32>} : memref<32x68xf32, #tpu.memory_space<vmem>>, vector<32x68xf32>,
    %c0_8 = arith.constant 0 : index
    %c2 = arith.constant 2 : index
    %12 = vector.load %arg10[%c0_8, %c2] : memref<32x68xf32, #tpu.memory_space<vmem>>, vector<32x64xf32>
    tpu.vector_store %arg10[%c0_8, %c2], %9 {strides = array<i32>} : memref<32x68xf32, #tpu.memory_space<vmem>>, vector<32x64xf32>,
    %c0_9 = arith.constant 0 : index
    %c0_10 = arith.constant 0 : index
    %13 = vector.load %arg3[%c0_9, %c0_10] : memref<32x5xf32, #tpu.memory_space<vmem>>, vector<32x1xf32>
    %c0_11 = arith.constant 0 : index
    %c0_12 = arith.constant 0 : index
    %14 = vector.load %arg10[%c0_11, %c0_12] : memref<32x68xf32, #tpu.memory_space<vmem>>, vector<32x64xf32>
    %15 = vector.broadcast %13 : vector<32x1xf32> to vector<32x64xf32>
    %16 = arith.mulf %15, %14 : vector<32x64xf32>
    %c0_13 = arith.constant 0 : index
    %c1_14 = arith.constant 1 : index
    %17 = vector.load %arg3[%c0_13, %c1_14] : memref<32x5xf32, #tpu.memory_space<vmem>>, vector<32x1xf32>
    %c0_15 = arith.constant 0 : index
    %c1_16 = arith.constant 1 : index
    %18 = vector.load %arg10[%c0_15, %c1_16] : memref<32x68xf32, #tpu.memory_space<vmem>>, vector<32x64xf32>
    %19 = vector.broadcast %17 : vector<32x1xf32> to vector<32x64xf32>
    %20 = arith.mulf %19, %18 : vector<32x64xf32>
    %21 = arith.addf %16, %20 : vector<32x64xf32>
    %c0_17 = arith.constant 0 : index
    %c2_18 = arith.constant 2 : index
    %22 = vector.load %arg3[%c0_17, %c2_18] : memref<32x5xf32, #tpu.memory_space<vmem>>, vector<32x1xf32>
    %c0_19 = arith.constant 0 : index
    %c2_20 = arith.constant 2 : index
    %23 = vector.load %arg10[%c0_19, %c2_20] : memref<32x68xf32, #tpu.memory_space<vmem>>, vector<32x64xf32>
    %24 = vector.broadcast %22 : vector<32x1xf32> to vector<32x64xf32>
    %25 = arith.mulf %24, %23 : vector<32x64xf32>
    %26 = arith.addf %21, %25 : vector<32x64xf32>
    %c0_21 = arith.constant 0 : index
    %c3 = arith.constant 3 : index
    %27 = vector.load %arg3[%c0_21, %c3] : memref<32x5xf32, #tpu.memory_space<vmem>>, vector<32x1xf32>
    %c0_22 = arith.constant 0 : index
    %c3_23 = arith.constant 3 : index
    %28 = vector.load %arg10[%c0_22, %c3_23] : memref<32x68xf32, #tpu.memory_space<vmem>>, vector<32x64xf32>
    %29 = vector.broadcast %27 : vector<32x1xf32> to vector<32x64xf32>
    %30 = arith.mulf %29, %28 : vector<32x64xf32>
    %31 = arith.addf %26, %30 : vector<32x64xf32>
    %c0_24 = arith.constant 0 : index
    %c4 = arith.constant 4 : index
    %32 = vector.load %arg3[%c0_24, %c4] : memref<32x5xf32, #tpu.memory_space<vmem>>, vector<32x1xf32>
    %c0_25 = arith.constant 0 : index
    %c4_26 = arith.constant 4 : index
    %33 = vector.load %arg10[%c0_25, %c4_26] : memref<32x68xf32, #tpu.memory_space<vmem>>, vector<32x64xf32>
    %34 = vector.broadcast %32 : vector<32x1xf32> to vector<32x64xf32>
    %35 = arith.mulf %34, %33 : vector<32x64xf32>
    %36 = arith.addf %31, %35 : vector<32x64xf32>
    %c0_27 = arith.constant 0 : index
    %c2_28 = arith.constant 2 : index
    %37 = vector.load %arg2[%c0_27, %c2_28] : memref<32x4xf32, #tpu.memory_space<vmem>>, vector<32x1xf32>
    %38 = vector.broadcast %37 : vector<32x1xf32> to vector<32x64xf32>
    %39 = arith.mulf %36, %38 : vector<32x64xf32>
    %c0_29 = arith.constant 0 : index
    %c3_30 = arith.constant 3 : index
    %40 = vector.load %arg2[%c0_29, %c3_30] : memref<32x4xf32, #tpu.memory_space<vmem>>, vector<32x1xf32>
    %41 = vector.broadcast %40 : vector<32x1xf32> to vector<32x64xf32>
    %42 = arith.addf %39, %41 : vector<32x64xf32>
    %cst_31 = arith.constant 0.000000e+00 : f32
    %43 = vector.broadcast %cst_31 : f32 to vector<32x64xf32>
    %44 = arith.maximumf %42, %43 : vector<32x64xf32>
    %cst_32 = arith.constant 0.000000e+00 : f32
    %45 = vector.broadcast %cst_32 : f32 to vector<32x68xf32>
    %c0_33 = arith.constant 0 : index
    %c0_34 = arith.constant 0 : index
    %46 = vector.load %arg10[%c0_33, %c0_34] : memref<32x68xf32, #tpu.memory_space<vmem>>, vector<32x68xf32>
    tpu.vector_store %arg10[%c0_33, %c0_34], %45 {strides = array<i32>} : memref<32x68xf32, #tpu.memory_space<vmem>>, vector<32x68xf32>,
    %c0_35 = arith.constant 0 : index
    %c2_36 = arith.constant 2 : index
    %47 = vector.load %arg10[%c0_35, %c2_36] : memref<32x68xf32, #tpu.memory_space<vmem>>, vector<32x64xf32>
    tpu.vector_store %arg10[%c0_35, %c2_36], %44 {strides = array<i32>} : memref<32x68xf32, #tpu.memory_space<vmem>>, vector<32x64xf32>,
    %c0_37 = arith.constant 0 : index
    %c0_38 = arith.constant 0 : index
    %48 = vector.load %arg4[%c0_37, %c0_38] : memref<32x5xf32, #tpu.memory_space<vmem>>, vector<32x1xf32>
    %c0_39 = arith.constant 0 : index
    %c0_40 = arith.constant 0 : index
    %49 = vector.load %arg10[%c0_39, %c0_40] : memref<32x68xf32, #tpu.memory_space<vmem>>, vector<32x64xf32>
    %50 = vector.broadcast %48 : vector<32x1xf32> to vector<32x64xf32>
    %51 = arith.mulf %50, %49 : vector<32x64xf32>
    %c0_41 = arith.constant 0 : index
    %c1_42 = arith.constant 1 : index
    %52 = vector.load %arg4[%c0_41, %c1_42] : memref<32x5xf32, #tpu.memory_space<vmem>>, vector<32x1xf32>
    %c0_43 = arith.constant 0 : index
    %c1_44 = arith.constant 1 : index
    %53 = vector.load %arg10[%c0_43, %c1_44] : memref<32x68xf32, #tpu.memory_space<vmem>>, vector<32x64xf32>
    %54 = vector.broadcast %52 : vector<32x1xf32> to vector<32x64xf32>
    %55 = arith.mulf %54, %53 : vector<32x64xf32>
    %56 = arith.addf %51, %55 : vector<32x64xf32>
    %c0_45 = arith.constant 0 : index
    %c2_46 = arith.constant 2 : index
    %57 = vector.load %arg4[%c0_45, %c2_46] : memref<32x5xf32, #tpu.memory_space<vmem>>, vector<32x1xf32>
    %c0_47 = arith.constant 0 : index
    %c2_48 = arith.constant 2 : index
    %58 = vector.load %arg10[%c0_47, %c2_48] : memref<32x68xf32, #tpu.memory_space<vmem>>, vector<32x64xf32>
    %59 = vector.broadcast %57 : vector<32x1xf32> to vector<32x64xf32>
    %60 = arith.mulf %59, %58 : vector<32x64xf32>
    %61 = arith.addf %56, %60 : vector<32x64xf32>
    %c0_49 = arith.constant 0 : index
    %c3_50 = arith.constant 3 : index
    %62 = vector.load %arg4[%c0_49, %c3_50] : memref<32x5xf32, #tpu.memory_space<vmem>>, vector<32x1xf32>
    %c0_51 = arith.constant 0 : index
    %c3_52 = arith.constant 3 : index
    %63 = vector.load %arg10[%c0_51, %c3_52] : memref<32x68xf32, #tpu.memory_space<vmem>>, vector<32x64xf32>
    %64 = vector.broadcast %62 : vector<32x1xf32> to vector<32x64xf32>
    %65 = arith.mulf %64, %63 : vector<32x64xf32>
    %66 = arith.addf %61, %65 : vector<32x64xf32>
    %c0_53 = arith.constant 0 : index
    %c4_54 = arith.constant 4 : index
    %67 = vector.load %arg4[%c0_53, %c4_54] : memref<32x5xf32, #tpu.memory_space<vmem>>, vector<32x1xf32>
    %c0_55 = arith.constant 0 : index
    %c4_56 = arith.constant 4 : index
    %68 = vector.load %arg10[%c0_55, %c4_56] : memref<32x68xf32, #tpu.memory_space<vmem>>, vector<32x64xf32>
    %69 = vector.broadcast %67 : vector<32x1xf32> to vector<32x64xf32>
    %70 = arith.mulf %69, %68 : vector<32x64xf32>
    %71 = arith.addf %66, %70 : vector<32x64xf32>
    %c0_57 = arith.constant 0 : index
    %c0_58 = arith.constant 0 : index
    %72 = vector.load %arg5[%c0_57, %c0_58] : memref<32x32xf32, #tpu.memory_space<vmem>>, vector<32x32xf32>
    %cst_59 = arith.constant dense<0.000000e+00> : vector<32x64xf32>
    %73 = tpu.matmul %72, %71, %cst_59 {dimension_numbers = #tpu.dot_dimension_numbers<[1], [0], [0], [1], [0, 0, 1, 1], [], []>} : vector<32x32xf32>, vector<32x64xf32>, vector<32x64xf32> -> vector<32x64xf32>
    %74 = tpu.iota {dimensions = array<i32: 0>} : vector<64x32xi32>
    %75 = tpu.iota {dimensions = array<i32: 1>} : vector<64x32xi32>
    %c2_i32 = arith.constant 2 : i32
    %76 = vector.broadcast %c2_i32 : i32 to vector<64x32xi32>
    %77 = arith.muli %76, %75 : vector<64x32xi32>
    %78 = arith.cmpi eq, %74, %77 : vector<64x32xi32>
    %79 = arith.extui %78 : vector<64x32xi1> to vector<64x32xi32>
    %80 = arith.sitofp %79 : vector<64x32xi32> to vector<64x32xf32>
    %c2_i32_60 = arith.constant 2 : i32
    %81 = vector.broadcast %c2_i32_60 : i32 to vector<64x32xi32>
    %82 = arith.muli %81, %75 : vector<64x32xi32>
    %c1_i32 = arith.constant 1 : i32
    %83 = vector.broadcast %c1_i32 : i32 to vector<64x32xi32>
    %84 = arith.addi %82, %83 : vector<64x32xi32>
    %85 = arith.cmpi eq, %74, %84 : vector<64x32xi32>
    %86 = arith.extui %85 : vector<64x32xi1> to vector<64x32xi32>
    %87 = arith.sitofp %86 : vector<64x32xi32> to vector<64x32xf32>
    %cst_61 = arith.constant dense<0.000000e+00> : vector<32x32xf32>
    %88 = tpu.matmul %73, %80, %cst_61 {dimension_numbers = #tpu.dot_dimension_numbers<[1], [0], [0], [1], [0, 0, 1, 1], [], []>} : vector<32x64xf32>, vector<64x32xf32>, vector<32x32xf32> -> vector<32x32xf32>
    %cst_62 = arith.constant dense<0.000000e+00> : vector<32x32xf32>
    %89 = tpu.matmul %73, %87, %cst_62 {dimension_numbers = #tpu.dot_dimension_numbers<[1], [0], [0], [1], [0, 0, 1, 1], [], []>} : vector<32x64xf32>, vector<64x32xf32>, vector<32x32xf32> -> vector<32x32xf32>
    %90 = arith.maximumf %88, %89 : vector<32x32xf32>
    %cst_63 = arith.constant dense<0.000000e+00> : vector<32x32xf32>
    %91 = tpu.matmul %1, %80, %cst_63 {dimension_numbers = #tpu.dot_dimension_numbers<[1], [0], [0], [1], [0, 0, 1, 1], [], []>} : vector<32x64xf32>, vector<64x32xf32>, vector<32x32xf32> -> vector<32x32xf32>
    %cst_64 = arith.constant dense<0.000000e+00> : vector<32x32xf32>
    %92 = tpu.matmul %1, %87, %cst_64 {dimension_numbers = #tpu.dot_dimension_numbers<[1], [0], [0], [1], [0, 0, 1, 1], [], []>} : vector<32x64xf32>, vector<64x32xf32>, vector<32x32xf32> -> vector<32x32xf32>
    %93 = arith.maximumf %91, %92 : vector<32x32xf32>
    %cst_65 = arith.constant dense<0.000000e+00> : vector<32xf32>
    %94 = vector.multi_reduction <add>, %90, %cst_65 [1] : vector<32x32xf32> to vector<32xf32>
    %95 = vector.shape_cast %94 : vector<32xf32> to vector<32x1xf32>
    %cst_66 = arith.constant 3.125000e-02 : f32
    %96 = vector.broadcast %cst_66 : f32 to vector<32x1xf32>
    %97 = arith.mulf %95, %96 : vector<32x1xf32>
    %cst_67 = arith.constant dense<0xFF800000> : vector<32xf32>
    %98 = vector.multi_reduction <maximumf>, %90, %cst_67 [1] : vector<32x32xf32> to vector<32xf32>
    %99 = vector.shape_cast %98 : vector<32xf32> to vector<32x1xf32>
    %100 = tpu.concatenate %97, %99 in 1 : vector<32x1xf32>, vector<32x1xf32> -> vector<32x2xf32>
    %c0_68 = arith.constant 0 : index
    %c0_69 = arith.constant 0 : index
    %101 = vector.load %arg6[%c0_68, %c0_69] : memref<2x32xf32, #tpu.memory_space<vmem>>, vector<2x32xf32>
    %cst_70 = arith.constant dense<0.000000e+00> : vector<2x2xf32>
    %102 = tpu.matmul %101, %100, %cst_70 {dimension_numbers = #tpu.dot_dimension_numbers<[1], [0], [0], [1], [0, 0, 1, 1], [], []>} : vector<2x32xf32>, vector<32x2xf32>, vector<2x2xf32> -> vector<2x2xf32>
    %cst_71 = arith.constant 0.000000e+00 : f32
    %103 = vector.broadcast %cst_71 : f32 to vector<2x2xf32>
    %104 = arith.maximumf %102, %103 : vector<2x2xf32>
    %c0_72 = arith.constant 0 : index
    %c0_73 = arith.constant 0 : index
    %105 = vector.load %arg7[%c0_72, %c0_73] : memref<32x2xf32, #tpu.memory_space<vmem>>, vector<32x2xf32>
    %cst_74 = arith.constant dense<0.000000e+00> : vector<32x2xf32>
    %106 = tpu.matmul %105, %104, %cst_74 {dimension_numbers = #tpu.dot_dimension_numbers<[1], [0], [0], [1], [0, 0, 1, 1], [], []>} : vector<32x2xf32>, vector<2x2xf32>, vector<32x2xf32> -> vector<32x2xf32>
    %107 = vector.extract_strided_slice %106 {offsets = [0, 0], sizes = [32, 1], strides = [1, 1]} : vector<32x2xf32> to vector<32x1xf32>
    %108 = vector.extract_strided_slice %106 {offsets = [0, 1], sizes = [32, 1], strides = [1, 1]} : vector<32x2xf32> to vector<32x1xf32>
    %109 = arith.addf %107, %108 : vector<32x1xf32>
    %110 = arith.negf %109 : vector<32x1xf32>
    %111 = math.exp %110 : vector<32x1xf32>
    %cst_75 = arith.constant 1.000000e+00 : f32
    %112 = vector.broadcast %cst_75 : f32 to vector<32x1xf32>
    %113 = arith.addf %112, %111 : vector<32x1xf32>
    %114 = arith.divf %112, %113 : vector<32x1xf32>
    %115 = vector.broadcast %114 : vector<32x1xf32> to vector<32x32xf32>
    %116 = arith.mulf %115, %90 : vector<32x32xf32>
    %cst_76 = arith.constant dense<0.000000e+00> : vector<32xf32>
    %117 = vector.multi_reduction <add>, %116, %cst_76 [0] : vector<32x32xf32> to vector<32xf32>
    %118 = vector.shape_cast %117 : vector<32xf32> to vector<1x32xf32>
    %cst_77 = arith.constant 3.200000e+01 : f32
    %119 = vector.broadcast %cst_77 : f32 to vector<1x32xf32>
    %120 = arith.divf %118, %119 : vector<1x32xf32>
    %cst_78 = arith.constant dense<0xFF800000> : vector<32xf32>
    %121 = vector.multi_reduction <maximumf>, %116, %cst_78 [0] : vector<32x32xf32> to vector<32xf32>
    %122 = vector.shape_cast %121 : vector<32xf32> to vector<1x32xf32>
    %cst_79 = arith.constant 0.000000e+00 : f32
    %123 = vector.broadcast %cst_79 : f32 to vector<2x38xf32>
    %c0_80 = arith.constant 0 : index
    %c0_81 = arith.constant 0 : index
    %124 = vector.load %arg11[%c0_80, %c0_81] : memref<2x38xf32, #tpu.memory_space<vmem>>, vector<2x38xf32>
    tpu.vector_store %arg11[%c0_80, %c0_81], %123 {strides = array<i32>} : memref<2x38xf32, #tpu.memory_space<vmem>>, vector<2x38xf32>,
    %c0_82 = arith.constant 0 : index
    %c3_83 = arith.constant 3 : index
    %125 = vector.load %arg11[%c0_82, %c3_83] : memref<2x38xf32, #tpu.memory_space<vmem>>, vector<1x32xf32>
    tpu.vector_store %arg11[%c0_82, %c3_83], %120 {strides = array<i32>} : memref<2x38xf32, #tpu.memory_space<vmem>>, vector<1x32xf32>,
    %c1_84 = arith.constant 1 : index
    %c3_85 = arith.constant 3 : index
    %126 = vector.load %arg11[%c1_84, %c3_85] : memref<2x38xf32, #tpu.memory_space<vmem>>, vector<1x32xf32>
    tpu.vector_store %arg11[%c1_84, %c3_85], %122 {strides = array<i32>} : memref<2x38xf32, #tpu.memory_space<vmem>>, vector<1x32xf32>,
    %c0_86 = arith.constant 0 : index
    %c0_87 = arith.constant 0 : index
    %127 = vector.load %arg8[%c0_86, %c0_87] : memref<2x7xf32, #tpu.memory_space<vmem>>, vector<2x1xf32>
    %c0_88 = arith.constant 0 : index
    %c0_89 = arith.constant 0 : index
    %128 = vector.load %arg11[%c0_88, %c0_89] : memref<2x38xf32, #tpu.memory_space<vmem>>, vector<2x32xf32>
    %129 = vector.broadcast %127 : vector<2x1xf32> to vector<2x32xf32>
    %130 = arith.mulf %129, %128 : vector<2x32xf32>
    %c0_90 = arith.constant 0 : index
    %c1_91 = arith.constant 1 : index
    %131 = vector.load %arg8[%c0_90, %c1_91] : memref<2x7xf32, #tpu.memory_space<vmem>>, vector<2x1xf32>
    %c0_92 = arith.constant 0 : index
    %c1_93 = arith.constant 1 : index
    %132 = vector.load %arg11[%c0_92, %c1_93] : memref<2x38xf32, #tpu.memory_space<vmem>>, vector<2x32xf32>
    %133 = vector.broadcast %131 : vector<2x1xf32> to vector<2x32xf32>
    %134 = arith.mulf %133, %132 : vector<2x32xf32>
    %135 = arith.addf %130, %134 : vector<2x32xf32>
    %c0_94 = arith.constant 0 : index
    %c2_95 = arith.constant 2 : index
    %136 = vector.load %arg8[%c0_94, %c2_95] : memref<2x7xf32, #tpu.memory_space<vmem>>, vector<2x1xf32>
    %c0_96 = arith.constant 0 : index
    %c2_97 = arith.constant 2 : index
    %137 = vector.load %arg11[%c0_96, %c2_97] : memref<2x38xf32, #tpu.memory_space<vmem>>, vector<2x32xf32>
    %138 = vector.broadcast %136 : vector<2x1xf32> to vector<2x32xf32>
    %139 = arith.mulf %138, %137 : vector<2x32xf32>
    %140 = arith.addf %135, %139 : vector<2x32xf32>
    %c0_98 = arith.constant 0 : index
    %c3_99 = arith.constant 3 : index
    %141 = vector.load %arg8[%c0_98, %c3_99] : memref<2x7xf32, #tpu.memory_space<vmem>>, vector<2x1xf32>
    %c0_100 = arith.constant 0 : index
    %c3_101 = arith.constant 3 : index
    %142 = vector.load %arg11[%c0_100, %c3_101] : memref<2x38xf32, #tpu.memory_space<vmem>>, vector<2x32xf32>
    %143 = vector.broadcast %141 : vector<2x1xf32> to vector<2x32xf32>
    %144 = arith.mulf %143, %142 : vector<2x32xf32>
    %145 = arith.addf %140, %144 : vector<2x32xf32>
    %c0_102 = arith.constant 0 : index
    %c4_103 = arith.constant 4 : index
    %146 = vector.load %arg8[%c0_102, %c4_103] : memref<2x7xf32, #tpu.memory_space<vmem>>, vector<2x1xf32>
    %c0_104 = arith.constant 0 : index
    %c4_105 = arith.constant 4 : index
    %147 = vector.load %arg11[%c0_104, %c4_105] : memref<2x38xf32, #tpu.memory_space<vmem>>, vector<2x32xf32>
    %148 = vector.broadcast %146 : vector<2x1xf32> to vector<2x32xf32>
    %149 = arith.mulf %148, %147 : vector<2x32xf32>
    %150 = arith.addf %145, %149 : vector<2x32xf32>
    %c0_106 = arith.constant 0 : index
    %c5 = arith.constant 5 : index
    %151 = vector.load %arg8[%c0_106, %c5] : memref<2x7xf32, #tpu.memory_space<vmem>>, vector<2x1xf32>
    %c0_107 = arith.constant 0 : index
    %c5_108 = arith.constant 5 : index
    %152 = vector.load %arg11[%c0_107, %c5_108] : memref<2x38xf32, #tpu.memory_space<vmem>>, vector<2x32xf32>
    %153 = vector.broadcast %151 : vector<2x1xf32> to vector<2x32xf32>
    %154 = arith.mulf %153, %152 : vector<2x32xf32>
    %155 = arith.addf %150, %154 : vector<2x32xf32>
    %c0_109 = arith.constant 0 : index
    %c6 = arith.constant 6 : index
    %156 = vector.load %arg8[%c0_109, %c6] : memref<2x7xf32, #tpu.memory_space<vmem>>, vector<2x1xf32>
    %c0_110 = arith.constant 0 : index
    %c6_111 = arith.constant 6 : index
    %157 = vector.load %arg11[%c0_110, %c6_111] : memref<2x38xf32, #tpu.memory_space<vmem>>, vector<2x32xf32>
    %158 = vector.broadcast %156 : vector<2x1xf32> to vector<2x32xf32>
    %159 = arith.mulf %158, %157 : vector<2x32xf32>
    %160 = arith.addf %155, %159 : vector<2x32xf32>
    %161 = vector.extract_strided_slice %160 {offsets = [0, 0], sizes = [1, 32], strides = [1, 1]} : vector<2x32xf32> to vector<1x32xf32>
    %162 = vector.extract_strided_slice %160 {offsets = [1, 0], sizes = [1, 32], strides = [1, 1]} : vector<2x32xf32> to vector<1x32xf32>
    %163 = arith.addf %161, %162 : vector<1x32xf32>
    %164 = arith.negf %163 : vector<1x32xf32>
    %165 = math.exp %164 : vector<1x32xf32>
    %cst_112 = arith.constant 1.000000e+00 : f32
    %166 = vector.broadcast %cst_112 : f32 to vector<1x32xf32>
    %167 = arith.addf %166, %165 : vector<1x32xf32>
    %168 = arith.divf %166, %167 : vector<1x32xf32>
    %169 = vector.broadcast %168 : vector<1x32xf32> to vector<32x32xf32>
    %170 = arith.mulf %169, %116 : vector<32x32xf32>
    %171 = arith.addf %170, %93 : vector<32x32xf32>
    %c0_113 = arith.constant 0 : index
    %c0_114 = arith.constant 0 : index
    %c0_115 = arith.constant 0 : index
    %172 = vector.load %arg9[%c0_113, %c0_114, %c0_115] : memref<1x32x32xf32, #tpu.memory_space<vmem>>, vector<1x32x32xf32>
    %173 = vector.shape_cast %172 : vector<1x32x32xf32> to vector<32x32xf32>
    %174 = vector.shape_cast %171 : vector<32x32xf32> to vector<1x32x32xf32>
    tpu.vector_store %arg9[%c0_113, %c0_114, %c0_115], %174 {strides = array<i32>} : memref<1x32x32xf32, #tpu.memory_space<vmem>>, vector<1x32x32xf32>,
    return
  }
  func.func @transform_0(%arg0: i32) -> (i32, i32, i32) {
    %c0_i32 = arith.constant 0 : i32
    %c0_i32_0 = arith.constant 0 : i32
    %c0_i32_1 = arith.constant 0 : i32
    return %arg0, %c0_i32, %c0_i32_0 : i32, i32, i32
  }
  func.func @transform_1(%arg0: i32) -> (i32, i32) {
    %c0_i32 = arith.constant 0 : i32
    %c0_i32_0 = arith.constant 0 : i32
    %c0_i32_1 = arith.constant 0 : i32
    return %c0_i32, %c0_i32_0 : i32, i32
  }
  func.func @transform_2(%arg0: i32) -> (i32, i32) {
    %c0_i32 = arith.constant 0 : i32
    %c0_i32_0 = arith.constant 0 : i32
    %c0_i32_1 = arith.constant 0 : i32
    return %c0_i32, %c0_i32_0 : i32, i32
  }
  func.func @transform_3(%arg0: i32) -> (i32, i32) {
    %c0_i32 = arith.constant 0 : i32
    %c0_i32_0 = arith.constant 0 : i32
    %c0_i32_1 = arith.constant 0 : i32
    return %c0_i32, %c0_i32_0 : i32, i32
  }
  func.func @transform_4(%arg0: i32) -> (i32, i32) {
    %c0_i32 = arith.constant 0 : i32
    %c0_i32_0 = arith.constant 0 : i32
    %c0_i32_1 = arith.constant 0 : i32
    return %c0_i32, %c0_i32_0 : i32, i32
  }
  func.func @transform_5(%arg0: i32) -> (i32, i32) {
    %c0_i32 = arith.constant 0 : i32
    %c0_i32_0 = arith.constant 0 : i32
    %c0_i32_1 = arith.constant 0 : i32
    return %c0_i32, %c0_i32_0 : i32, i32
  }
  func.func @transform_6(%arg0: i32) -> (i32, i32) {
    %c0_i32 = arith.constant 0 : i32
    %c0_i32_0 = arith.constant 0 : i32
    %c0_i32_1 = arith.constant 0 : i32
    return %c0_i32, %c0_i32_0 : i32, i32
  }
  func.func @transform_7(%arg0: i32) -> (i32, i32) {
    %c0_i32 = arith.constant 0 : i32
    %c0_i32_0 = arith.constant 0 : i32
    %c0_i32_1 = arith.constant 0 : i32
    return %c0_i32, %c0_i32_0 : i32, i32
  }
  func.func @transform_8(%arg0: i32) -> (i32, i32, i32) {
    %c0_i32 = arith.constant 0 : i32
    %c0_i32_0 = arith.constant 0 : i32
    %c0_i32_1 = arith.constant 0 : i32
    return %arg0, %c0_i32, %c0_i32_0 : i32, i32, i32
  }
}

</mosaic_0001>

<bundles_post_ra>
// kernel: resnet_1d_depthwise_block.1
= control target key start
LH: loop header
LB: loop body
LE: loop exit
PB: predicated region body
PF: predicated region fallthrough
CT: control target
= control target key end

     0   :  { %13 = vsyncpa [#allocation5], 0  ;;  %s3195_s0 = inlined_call_operand.vmem [shape: f32[2,32,64], index: 0, kind: input, shape index: {}]   ;;  %s3196_s1 = inlined_call_operand.vmem [shape: f32[32,4], index: 1, kind: input, shape index: {}]   ;;  %s3197_s2 = inlined_call_operand.vmem [shape: f32[32,5], index: 2, kind: input, shape index: {}]   ;;  %s3198_s3 = inlined_call_operand.vmem [shape: f32[32,5], index: 3, kind: input, shape index: {}]   ;;  %s3199_s4 = inlined_call_operand.vmem [shape: f32[32,32], index: 4, kind: input, shape index: {}]   ;;  %s3200_s5 = inlined_call_operand.vmem [shape: f32[2,32], index: 5, kind: input, shape index: {}]   ;;  %s3201_s6 = inlined_call_operand.vmem [shape: f32[32,2], index: 6, kind: input, shape index: {}]   ;;  %s3202_s7 = inlined_call_operand.vmem [shape: f32[2,7], index: 7, kind: input, shape index: {}]   ;;  %s3203_s8 = inlined_call_operand.hbm [shape: f32[2,32,32], index: 8, kind: output, shape index: {}]  }
   0x1   :  { %15 = vsyncpa [#allocation5 + $0x1], 0  ;;  %s2490_s27 = smov 0   ;;  %s2492_s28 = smov 0  }
   0x2   :  { %s2494_s29 = smov 0   ;;  %s2496_s30 = smov 0  }
   0x3 LB: > { %s2511_s9 = sadd.s32 4294967295, %s2421_s30   ;;  %s1875_s10 = sadd.s32 4294967294, %s2421_s30   ;;  %s2421_s30 = sphi %s2496_s30, %s3250_s30   ;;  %s2417_s29 = sphi %s2494_s29, %s3249_s29   ;;  %s2413_s28 = sphi %s2492_s28, %s3248_s28   ;;  %s2409_s27 = sphi %s2490_s27, %s3247_s27  }
   0x4   : > { %s2515_s11 = sadd.s32 1, %s2421_s30   ;;  %s201_s12 = sadd.s32 1, %s2417_s29 }
   0x5   : > { %s198_s13 = ssub.s32 %s2421_s30, %s2515_s11  ;;  %p211_p0 = scmp.ne.s32.totalorder %s2417_s29, %s2413_s28 }
   0x6   : > { %p199_p1 = scmp.eq.s32.totalorder %s198_s13, 0  ;;  %p212_p2 = scmp.eq.s32.totalorder %s2511_s9, 1 }
   0x7   : > { %p217_p3 = scmp.ne.s32.totalorder %s2413_s28, %s2409_s27  ;;  %p218_p4 = scmp.eq.s32.totalorder %s1875_s10, 1 }
   0x8   : > { %s2526_s14 = scalar_select %p199_p1, %s2417_s29, %s201_s12  }
   0x9   : > { %p2528_p5 = por %p212_p2, %p211_p0  ;;  %p2532_p6 = por %p218_p4, %p217_p3 }
   0xa   : > { %p1878_p7 = scmp.ge.s32.totalorder %s2421_s30, 1  ;;  %p265_p8 = scmp.lt.s32.totalorder %s2421_s30, 3 }
   0xc   : > { %p266_p9 = pnand %p1878_p7, %p265_p8 }
   0xd   : > { %v2541_v0 = vld [vmem:[%s3196_s1] sm:$0xff] (!%p266_p9)  ;;  %v2423_v1 = vmov (!%p266_p9), 1   ;;  %v2424_v2 = vmov (!%p266_p9), 0   ;;  %v2550_v3 = vld [vmem:[%s3196_s1 + $0x8] sm:$0xff] (!%p266_p9)  ;;  %v2557_v4 = vld [vmem:[%s3196_s1 + $0x10] sm:$0xff] (!%p266_p9)  ;;  %v2425_v8 = vmov (!%p266_p9), 2  }
   0xe   : > { %269 = sbr.rel (%p266_p9) target bundleno = 2345 (0x929), region = 52  ;;  %2294 = vset.pattern.permute.xlu1 (!%p266_p9), %v2423_v1  ;;  %2293 = vset.pattern.permute.xlu0 (!%p266_p9), %v2424_v2  ;;  %v2562_v5 = vld [vmem:[%s3196_s1 + $0x18] sm:$0xff] (!%p266_p9)  ;;  %v2574_v6 = vld [vmem:[%s3197_s2] sm:$0xff] (!%p266_p9)  ;;  %v2579_v7 = vld [vmem:[%s3197_s2 + $0x8] sm:$0xff] (!%p266_p9)  ;;  %v2426_v11 = vmov (!%p266_p9), 4   ;;  %v2427_v12 = vmov (!%p266_p9), 3  }
   0xf   : > { %337 = vperm.xlu1 (!%p266_p9), %2294, %v2541_v0   ;;  %314 = vperm.xlu0 (!%p266_p9), %2293, %v2541_v0   ;;  %v2591_v9 = vld [vmem:[%s3197_s2 + $0x18] sm:$0xff] (!%p266_p9)  ;;  %v2596_v10 = vld [vmem:[%s3197_s2 + $0x10] sm:$0xff] (!%p266_p9)  ;;  %vm360_vm0 = vcmask (!%p266_p9), 556032   ;;  %v2428_v13 = vmov (!%p266_p9), 0.0   ;;  %p299_p10 = scmp.lt.s32.totalorder (!%p266_p9), %s2511_s9, 1  ;;  %s2429_s25 = smov (!%p266_p9), 2  }
  0x10   : > { %361 = vst.msk [vmem:[#allocation2] sm:$0xff] (!%p266_p9), %vm360_vm0, %v2428_v13  ;;  %362 = vst.msk [vmem:[#allocation2 + $0x8] sm:$0xff] (!%p266_p9), %vm360_vm0, %v2428_v13  ;;  %vm381_vm1 = vcmask (!%p266_p9), 539664   ;;  %s2430_s26 = smov (!%p266_p9), 127   ;;  %s2431_s10 = smov (!%p266_p9), 126   ;;  %vm3204_vm2 = vcmask (!%p266_p9), 261120  }
  0x11   : > { %363 = vst.msk [vmem:[#allocation2 + $0x10] sm:$0xff] (!%p266_p9), %vm360_vm0, %v2428_v13  ;;  %364 = vst.msk [vmem:[#allocation2 + $0x18] sm:$0xff] (!%p266_p9), %vm360_vm0, %v2428_v13  ;;  %s2432_s12 = smov (!%p266_p9), 125   ;;  %s2433_s13 = smov (!%p266_p9), 124  }
  0x12   : > { %s2437_s18 = smov (!%p266_p9), 3   ;;  %s2440_s19 = smov (!%p266_p9), 123  }
  0x13   : > { %341 = vperm.xlu1 (!%p266_p9), %2294, %v2550_v3   ;;  %319 = vperm.xlu0 (!%p266_p9), %2293, %v2550_v3   ;;  %s2442_s17 = smov (!%p266_p9), [#allocation4]  }
  0x15   : > { %s300_s20 = scalar_select %p299_p10, %s2511_s9, 1 }
  0x17   : > { %324 = vperm.xlu0 %2293, %v2557_v4   ;;  %2295 = vset.pattern.permute.xlu1 %v2424_v2  ;;  %s1966_s21 = sshll.u32 %s300_s20, 5  ;;  %s2441_s20 = smov 122  }
  0x18   : > { %329 = vperm.xlu1 %2295, %v2562_v5   ;;  %s303_s24 = scalar_lea.vmem %s3195_s0, %s1966_s21 }
  0x19   : > { %v2621_v14 = vld [vmem:[%s303_s24] sm:$0xff]  ;;  %v2624_v18 = vld [vmem:[%s303_s24 + $0x8] sm:$0xff]  ;;  %v2628_v26 = vld [vmem:[%s303_s24 + $0x10] sm:$0xff] }
  0x1a   : > { %v2630_v29 = vld [vmem:[%s303_s24 + $0x18] sm:$0xff] }
  0x1b   : > { %2296 = vset.pattern.permute.xlu0 %v2423_v1 }
  0x1c   : > { %345 = vperm.xlu0 %2296, %v2557_v4   ;;  %2297 = vset.pattern.permute.xlu1 %v2423_v1 }
  0x1d   : > { %349 = vperm.xlu1 %2297, %v2562_v5  }
  0x20   : > { %2299 = vset.pattern.permute.xlu0 %v2425_v8 }
  0x21   : > { %419 = vperm.xlu1 %2297, %v2574_v6   ;;  %463 = vperm.xlu0 %2299, %v2579_v7  }
  0x25   : > { %2298 = vset.pattern.permute.xlu1 %v2425_v8  ;;  %2300 = vset.pattern.permute.xlu0 %v2423_v1 }
  0x26   : > { %459 = vperm.xlu1 %2298, %v2574_v6   ;;  %423 = vperm.xlu0 %2300, %v2579_v7  }
  0x2a   : > { %2301 = vset.pattern.permute.xlu1 %v2423_v1  ;;  %427 = vperm.xlu0 %2300, %v2596_v10  }
  0x2b   : > { %431 = vperm.xlu1 %2301, %v2591_v9  }
  0x2e   : > { %2304 = vset.pattern.permute.xlu0 %v2426_v11 }
  0x2f   : > { %2302 = vset.pattern.permute.xlu1 %v2427_v12 }
  0x30   : > { %499 = vperm.xlu1 %2302, %v2574_v6  }
  0x34   : > { %2303 = vset.pattern.permute.xlu1 %v2425_v8 }
  0x35   : > { %467 = vperm.xlu1 %2303, %v2596_v10  }
  0x39   : > { %471 = vperm.xlu1 %2303, %v2591_v9  }
  0x3d   : > { %2306 = vset.pattern.permute.xlu1 %v2426_v11 }
  0x8e   : > { %v338_v15 = vpop.permute.xlu1 %337  ;;  %v315_v16 = vpop.permute.xlu0 %314 }
  0x8f   : > { %v332_v17 = vmul.f32 %v315_v16, %v2621_v14 }
  0x91   : > { %v352_v19 = vadd.f32 %v338_v15, %v332_v17 }
  0x92   : > { %v320_v20 = vpop.permute.xlu0 %319  ;;  %v342_v21 = vpop.permute.xlu1 %341 }
  0x93   : > { %v333_v22 = vmul.f32 %v320_v20, %v2624_v18  ;;  %v356_v23 = vmax.f32 %v352_v19, 0.0 }
  0x95   : > { %v353_v24 = vadd.f32 %v342_v21, %v333_v22  ;;  %369 = vrot.lane.b32.xlu1 %v356_v23, %s2429_s25  ;;  %v2723_v22 = vld [vmem:[%s3198_s3 + $0x8] sm:$0xff]  ;;  %v2730_v23 = vld [vmem:[%s3198_s3] sm:$0xff] }
  0x96   : > { %v325_v25 = vpop.permute.xlu0 %324 }
  0x97   : > { %v357_v27 = vmax.f32 %v353_v24, 0.0  ;;  %v330_v28 = vpop.permute.xlu1 %329  ;;  %v334_v30 = vmul.f32 %v325_v25, %v2628_v26  ;;  %v2735_v24 = vld [vmem:[%s3198_s3 + $0x10] sm:$0xff]  ;;  %v2743_v25 = vld [vmem:[%s3198_s3 + $0x18] sm:$0xff] }
  0x98   : > { %v335_v31 = vmul.f32 %v330_v28, %v2630_v29 }
  0x99   : > { %371 = vrot.lane.b32.xlu0 %v357_v27, %s2429_s25  ;;  %543 = vperm.xlu1 %2306, %v2579_v7  }
  0x9b   : > { %v346_v32 = vpop.permute.xlu0 %345 }
  0x9c   : > { %v354_v33 = vadd.f32 %v346_v32, %v334_v30  ;;  %v350_v34 = vpop.permute.xlu1 %349 }
  0x9d   : > { %539 = vperm.xlu0 %2304, %v2574_v6   ;;  %2307 = vset.pattern.permute.xlu1 %v2427_v12  ;;  %v355_v35 = vadd.f32 %v350_v34, %v335_v31 }
  0x9e   : > { %507 = vperm.xlu1 %2307, %v2596_v10   ;;  %v358_v36 = vmax.f32 %v354_v33, 0.0 }
  0x9f   : > { %v359_v37 = vmax.f32 %v355_v35, 0.0 }
  0xa0   : > { %v420_v38 = vpop.permute.xlu1 %419  ;;  %v464_v42 = vpop.permute.xlu0 %463 }
  0xa1   : > { %2305 = vset.pattern.permute.xlu0 %v2427_v12 }
  0xa2   : > { %503 = vperm.xlu0 %2305, %v2579_v7   ;;  %373 = vrot.lane.b32.xlu1 %v358_v36, %s2429_s25 }
  0xa3   : > { %2308 = vset.pattern.permute.xlu1 %v2426_v11 }
  0xa5   : > { %v460_v39 = vpop.permute.xlu1 %459  ;;  %v424_v44 = vpop.permute.xlu0 %423 }
  0xa6   : > { %511 = vperm.xlu0 %2305, %v2591_v9   ;;  %375 = vrot.lane.b32.xlu1 %v359_v37, %s2429_s25 }
  0xa9   : > { %v428_v46 = vpop.permute.xlu0 %427 }
  0xaa   : > { %2309 = vset.pattern.permute.xlu0 %v2424_v2  ;;  %547 = vperm.xlu1 %2308, %v2596_v10   ;;  %v432_v40 = vpop.permute.xlu1 %431 }
  0xab   : > { %396 = vperm.xlu0 %2309, %v2574_v6  }
  0xae   : > { %551 = vperm.xlu1 %2308, %v2591_v9  }
  0xaf   : > { %411 = vperm.xlu0 %2309, %v2591_v9   ;;  %v500_v41 = vpop.permute.xlu1 %499 }
  0xb2   : > { %2310 = vset.pattern.permute.xlu1 %v2424_v2 }
  0xb3   : > { %401 = vperm.xlu1 %2310, %v2579_v7   ;;  %2312 = vset.pattern.permute.xlu0 %v2425_v8 }
  0xb4   : > { %589 = vperm.xlu0 %2312, %v2550_v3   ;;  %v468_v43 = vpop.permute.xlu1 %467 }
  0xb7   : > { %406 = vperm.xlu1 %2310, %v2596_v10  }
  0xb8   : > { %599 = vperm.xlu0 %2312, %v2562_v5   ;;  %v472_v45 = vpop.permute.xlu1 %471 }
  0xbb   : > { %2311 = vset.pattern.permute.xlu1 %v2425_v8 }
  0xbc   : > { %584 = vperm.xlu1 %2311, %v2541_v0   ;;  %2315 = vset.pattern.permute.xlu0 %v2427_v12 }
  0xbd   : > { %607 = vperm.xlu0 %2315, %v2541_v0  }
  0xc0   : > { %2313 = vset.pattern.permute.xlu1 %v2427_v12 }
  0xc1   : > { %611 = vperm.xlu1 %2313, %v2550_v3   ;;  %615 = vperm.xlu0 %2315, %v2557_v4  }
  0xc5   : > { %2314 = vset.pattern.permute.xlu1 %v2425_v8  ;;  %2318 = vset.pattern.permute.xlu0 %v2423_v1 }
  0xc6   : > { %594 = vperm.xlu1 %2314, %v2557_v4  }
  0xca   : > { %2316 = vset.pattern.permute.xlu1 %v2427_v12 }
  0xcb   : > { %619 = vperm.xlu1 %2316, %v2562_v5  }
  0xcf   : > { %2317 = vset.pattern.permute.xlu1 %v2423_v1 }
 0x107   : > { %v370_v47 = vpop.permute.xlu1 %369 }
 0x108   : > { %382 = vst.msk [vmem:[#allocation2] sm:$0xff] %vm381_vm1, %v370_v47 }
 0x10b   : > { %v372_v48 = vpop.permute.xlu0 %371 }
 0x10c   : > { %383 = vst.msk [vmem:[#allocation2 + $0x8] sm:$0xff] %vm381_vm1, %v372_v48 }
 0x10f   : > { %v2671_v49 = vld [vmem:[#allocation2] sm:$0xff] }
 0x110   : > { %v434_v50 = vmul.f32 %v420_v38, %v2671_v49  ;;  %630 = vst.msk [vmem:[#allocation2] sm:$0xff] %vm360_vm0, %v2428_v13  ;;  %v474_v53 = vmul.f32 %v460_v39, %v2671_v49  ;;  %v514_v63 = vmul.f32 %v500_v41, %v2671_v49 }
 0x112   : > { %442 = vrot.lane.b32.xlu1 %v434_v50, %s2430_s26 }
 0x113   : > { %v2677_v51 = vld [vmem:[#allocation2 + $0x8] sm:$0xff] }
 0x114   : > { %v435_v52 = vmul.f32 %v424_v44, %v2677_v51  ;;  %631 = vst.msk [vmem:[#allocation2 + $0x8] sm:$0xff] %vm360_vm0, %v2428_v13  ;;  %v475_v55 = vmul.f32 %v464_v42, %v2677_v51 }
 0x116   : > { %444 = vrot.lane.b32.xlu0 %v435_v52, %s2430_s26  ;;  %482 = vrot.lane.b32.xlu1 %v474_v53, %s2431_s10 }
 0x118   : > { %v544_v54 = vpop.permute.xlu1 %543 }
 0x119   : > { %v555_v15 = vmul.f32 %v544_v54, %v2677_v51 }
 0x11a   : > { %484 = vrot.lane.b32.xlu1 %v475_v55, %s2431_s10 }
 0x11c   : > { %v540_v59 = vpop.permute.xlu0 %539 }
 0x11d   : > { %v508_v56 = vpop.permute.xlu1 %507  ;;  %v554_v7 = vmul.f32 %v540_v59, %v2671_v49 }
 0x121   : > { %v374_v57 = vpop.permute.xlu1 %373  ;;  %v504_v3 = vpop.permute.xlu0 %503 }
 0x122   : > { %384 = vst.msk [vmem:[#allocation2 + $0x10] sm:$0xff] %vm381_vm1, %v374_v57  ;;  %v515_v4 = vmul.f32 %v504_v3, %v2677_v51 }
 0x125   : > { %v376_v58 = vpop.permute.xlu1 %375  ;;  %v512_v10 = vpop.permute.xlu0 %511 }
 0x126   : > { %385 = vst.msk [vmem:[#allocation2 + $0x18] sm:$0xff] %vm381_vm1, %v376_v58 }
 0x129   : > { %v2689_v60 = vld [vmem:[#allocation2 + $0x10] sm:$0xff]  ;;  %v548_v6 = vpop.permute.xlu1 %547 }
 0x12a   : > { %632 = vst.msk [vmem:[#allocation2 + $0x10] sm:$0xff] %vm360_vm0, %v2428_v13  ;;  %v436_v61 = vmul.f32 %v428_v46, %v2689_v60  ;;  %v476_v5 = vmul.f32 %v468_v43, %v2689_v60  ;;  %v516_v20 = vmul.f32 %v508_v56, %v2689_v60  ;;  %v556_v21 = vmul.f32 %v548_v6, %v2689_v60  ;;  %v397_v31 = vpop.permute.xlu0 %396 }
 0x12b   : > { %v414_v47 = vmul.f32 %v397_v31, %v2671_v49 }
 0x12c   : > { %446 = vrot.lane.b32.xlu1 %v436_v61, %s2430_s26 }
 0x12d   : > { %v2695_v62 = vld [vmem:[#allocation2 + $0x18] sm:$0xff]  ;;  %v552_v17 = vpop.permute.xlu1 %551 }
 0x12e   : > { %633 = vst.msk [vmem:[#allocation2 + $0x18] sm:$0xff] %vm360_vm0, %v2428_v13  ;;  %v437_v0 = vmul.f32 %v432_v40, %v2695_v62  ;;  %v477_v9 = vmul.f32 %v472_v45, %v2695_v62  ;;  %v517_v16 = vmul.f32 %v512_v10, %v2695_v62  ;;  %v557_v19 = vmul.f32 %v552_v17, %v2695_v62  ;;  %v412_v33 = vpop.permute.xlu0 %411 }
 0x12f   : > { %v417_v59 = vmul.f32 %v412_v33, %v2695_v62 }
 0x130   : > { %522 = vrot.lane.b32.xlu1 %v514_v63, %s2432_s12  ;;  %448 = vrot.lane.b32.xlu0 %v437_v0, %s2430_s26 }
 0x132   : > { %v402_v27 = vpop.permute.xlu1 %401 }
 0x133   : > { %v590_v35 = vpop.permute.xlu0 %589  ;;  %v415_v53 = vmul.f32 %v402_v27, %v2677_v51 }
 0x134   : > { %486 = vrot.lane.b32.xlu1 %v476_v5, %s2431_s10  ;;  %524 = vrot.lane.b32.xlu0 %v515_v4, %s2432_s12 }
 0x136   : > { %v407_v28 = vpop.permute.xlu1 %406 }
 0x137   : > { %v600_v37 = vpop.permute.xlu0 %599  ;;  %v416_v49 = vmul.f32 %v407_v28, %v2689_v60 }
 0x138   : > { %488 = vrot.lane.b32.xlu1 %v477_v9, %s2431_s10  ;;  %562 = vrot.lane.b32.xlu0 %v554_v7, %s2433_s13 }
 0x13b   : > { %v585_v30 = vpop.permute.xlu1 %584 }
 0x13c   : > { %564 = vrot.lane.b32.xlu1 %v555_v15, %s2433_s13  ;;  %528 = vrot.lane.b32.xlu0 %v517_v16, %s2432_s12  ;;  %v608_v39 = vpop.permute.xlu0 %607 }
 0x140   : > { %526 = vrot.lane.b32.xlu1 %v516_v20, %s2432_s12  ;;  %568 = vrot.lane.b32.xlu0 %v557_v19, %s2433_s13  ;;  %v612_v32 = vpop.permute.xlu1 %611  ;;  %v616_v41 = vpop.permute.xlu0 %615 }
 0x144   : > { %566 = vrot.lane.b32.xlu1 %v556_v21, %s2433_s13  ;;  %691 = vperm.xlu0 %2318, %v2723_v22  }
 0x145   : > { %v595_v34 = vpop.permute.xlu1 %594 }
 0x148   : > { %687 = vperm.xlu1 %2317, %v2730_v23   ;;  %695 = vperm.xlu0 %2318, %v2735_v24  }
 0x14a   : > { %v620_v36 = vpop.permute.xlu1 %619 }
 0x14c   : > { %2319 = vset.pattern.permute.xlu1 %v2425_v8  ;;  %2323 = vset.pattern.permute.xlu0 %v2425_v8 }
 0x14d   : > { %727 = vperm.xlu1 %2319, %v2730_v23   ;;  %739 = vperm.xlu0 %2323, %v2743_v25  }
 0x151   : > { %731 = vperm.xlu1 %2319, %v2723_v22   ;;  %2324 = vset.pattern.permute.xlu0 %v2427_v12 }
 0x152   : > { %767 = vperm.xlu0 %2324, %v2730_v23  }
 0x155   : > { %2320 = vset.pattern.permute.xlu1 %v2423_v1 }
 0x156   : > { %699 = vperm.xlu1 %2320, %v2743_v25  }
 0x15a   : > { %2321 = vset.pattern.permute.xlu1 %v2427_v12 }
 0x15b   : > { %771 = vperm.xlu1 %2321, %v2723_v22  }
 0x15f   : > { %2322 = vset.pattern.permute.xlu1 %v2425_v8 }
 0x160   : > { %735 = vperm.xlu1 %2322, %v2735_v24  }
 0x164   : > { %2325 = vset.pattern.permute.xlu1 %v2426_v11 }
 0x165   : > { %807 = vperm.xlu1 %2325, %v2730_v23  }
 0x169   : > { %811 = vperm.xlu1 %2325, %v2723_v22  }
 0x16d   : > { %2326 = vset.pattern.permute.xlu1 %v2427_v12 }
 0x184   : > { %v443_v38 = vpop.permute.xlu1 %442 }
 0x185   : > { %v454_v48 = vadd.f32 %v443_v38, %v414_v47 }
 0x188   : > { %v483_v40 = vpop.permute.xlu1 %482  ;;  %v445_v43 = vpop.permute.xlu0 %444 }
 0x189   : > { %v494_v54 = vadd.f32 %v483_v40, %v454_v48  ;;  %v455_v55 = vadd.f32 %v445_v43, %v415_v53 }
 0x18c   : > { %v485_v42 = vpop.permute.xlu1 %484 }
 0x18d   : > { %v495_v61 = vadd.f32 %v485_v42, %v455_v55 }
 0x19e   : > { %v447_v44 = vpop.permute.xlu1 %446 }
 0x19f   : > { %v456_v51 = vadd.f32 %v447_v44, %v416_v49 }
 0x1a2   : > { %v449_v45 = vpop.permute.xlu0 %448  ;;  %v523_v46 = vpop.permute.xlu1 %522 }
 0x1a3   : > { %v534_v56 = vadd.f32 %v523_v46, %v494_v54  ;;  %v457_v0 = vadd.f32 %v449_v45, %v417_v59 }
 0x1a6   : > { %v525_v50 = vpop.permute.xlu0 %524  ;;  %v487_v52 = vpop.permute.xlu1 %486 }
 0x1a7   : > { %v535_v3 = vadd.f32 %v525_v50, %v495_v61  ;;  %v496_v21 = vadd.f32 %v487_v52, %v456_v51 }
 0x1aa   : > { %v563_v57 = vpop.permute.xlu0 %562  ;;  %v489_v58 = vpop.permute.xlu1 %488 }
 0x1ab   : > { %v574_v63 = vadd.f32 %v563_v57, %v534_v56  ;;  %v497_v7 = vadd.f32 %v489_v58, %v457_v0 }
 0x1ad   : > { %v602_v4 = vmul.f32 %v585_v30, %v574_v63 }
 0x1ae   : > { %v529_v5 = vpop.permute.xlu0 %528  ;;  %v565_v6 = vpop.permute.xlu1 %564 }
 0x1af   : > { %v575_v9 = vadd.f32 %v565_v6, %v535_v3  ;;  %v622_v10 = vadd.f32 %v608_v39, %v602_v4  ;;  %v537_v15 = vadd.f32 %v529_v5, %v497_v7 }
 0x1b1   : > { %v603_v16 = vmul.f32 %v590_v35, %v575_v9  ;;  %v626_v17 = vmax.f32 %v622_v10, 0.0  ;;  %v846_v10 = vld [vmem:[%s3199_s4] sm:$0xff] }
 0x1b2   : > { %v569_v19 = vpop.permute.xlu0 %568  ;;  %v527_v20 = vpop.permute.xlu1 %526  ;;  %2042 = vmatprep.mubr.msk.f32.mxu0 %vm3204_vm2, %v846_v10 }
 0x1b3   : > { %v577_v62 = vadd.f32 %v569_v19, %v537_v15  ;;  %638 = vrot.lane.b32.xlu1 %v626_v17, %s2429_s25  ;;  %v623_v27 = vadd.f32 %v612_v32, %v603_v16  ;;  %v536_v30 = vadd.f32 %v527_v20, %v496_v21  ;;  %v948_v21 = vlaneseq }
 0x1b5   : > { %v605_v31 = vmul.f32 %v600_v37, %v577_v62  ;;  %v627_v33 = vmax.f32 %v623_v27, 0.0  ;;  %v2829_v62 = vshrl.u32 %v948_v21, 7  ;;  %v958_v27 = vand.u32 127, %v948_v21 }
 0x1b6   : > { %v567_v38 = vpop.permute.xlu1 %566 }
 0x1b7   : > { %v576_v40 = vadd.f32 %v567_v38, %v536_v30  ;;  %640 = vrot.lane.b32.xlu0 %v627_v33, %s2429_s25  ;;  %v625_v60 = vadd.f32 %v620_v36, %v605_v31  ;;  %v950_v31 = vadd.s32 8, %v2829_v62  ;;  %v959_v30 = vmul.u32 2, %v958_v27 }
 0x1b8   : > { %v951_v33 = vadd.s32 16, %v2829_v62  ;;  %v952_v38 = vadd.s32 24, %v2829_v62 }
 0x1b9   : > { %v604_v28 = vmul.f32 %v595_v34, %v576_v40  ;;  %v629_v39 = vmax.f32 %v625_v60, 0.0  ;;  %v953_v40 = vadd.s32 32, %v2829_v62  ;;  %v954_v60 = vadd.s32 40, %v2829_v62 }
 0x1ba   : > { %vm960_vm3 = vcmp.eq.s32.totalorder %v2829_v62, %v959_v30  ;;  %vm961_vm4 = vcmp.eq.s32.totalorder %v950_v31, %v959_v30  ;;  %vm962_vm5 = vcmp.eq.s32.totalorder %v951_v33, %v959_v30  ;;  %vm963_vm7 = vcmp.eq.s32.totalorder %v952_v38, %v959_v30 }
 0x1bb   : > { %644 = vrot.lane.b32.xlu1 %v629_v39, %s2429_s25  ;;  %v624_v35 = vadd.f32 %v616_v41, %v604_v28  ;;  %v955_v28 = vadd.s32 48, %v2829_v62  ;;  %v956_v39 = vadd.s32 56, %v2829_v62  ;;  %vm2839_vm6 = vmpackc.low %vm961_vm4, %vm960_vm3  ;;  %vm964_vm8 = vcmp.eq.s32.totalorder %v953_v40, %v959_v30 }
 0x1bc   : > { %vm965_vm9 = vcmp.eq.s32.totalorder %v954_v60, %v959_v30  ;;  %vm2847_vm12 = vmpackc.low %vm963_vm7, %vm962_vm5 }
 0x1bd   : > { %v628_v42 = vmax.f32 %v624_v35, 0.0  ;;  %v984_v35 = vadd.s32 1, %v959_v30  ;;  %vm2867_vm7 = vmpackc.low %vm965_vm9, %vm964_vm8  ;;  %vm967_vm2 = vcmp.eq.s32.totalorder %v956_v39, %v959_v30 }
 0x1bf   : > { %779 = vperm.xlu1 %2326, %v2743_v25   ;;  %642 = vrot.lane.b32.xlu0 %v628_v42, %s2429_s25  ;;  %vm985_vm10 = vcmp.eq.s32.totalorder %v2829_v62, %v984_v35  ;;  %vm986_vm11 = vcmp.eq.s32.totalorder %v950_v31, %v984_v35  ;;  %vm987_vm13 = vcmp.eq.s32.totalorder %v951_v33, %v984_v35 }
 0x1c0   : > { %vm988_vm14 = vcmp.eq.s32.totalorder %v952_v38, %v984_v35  ;;  %vm2851_vm15 = vmpackc.low %vm986_vm11, %vm985_vm10  ;;  %vm989_vm0 = vcmp.eq.s32.totalorder %v953_v40, %v984_v35  ;;  %vm991_vm3 = vcmp.eq.s32.totalorder %v955_v28, %v984_v35  ;;  %vm992_vm5 = vcmp.eq.s32.totalorder %v956_v39, %v984_v35 }
 0x1c1   : > { %vm2861_vm4 = vmpackc.low %vm988_vm14, %vm987_vm13  ;;  %vm966_vm11 = vcmp.eq.s32.totalorder %v955_v28, %v959_v30 }
 0x1c2   : > { %vm2881_vm13 = vmpackc.low %vm992_vm5, %vm991_vm3 }
 0x1c3   : > { %2327 = vset.pattern.permute.xlu1 %v2426_v11  ;;  %775 = vperm.xlu0 %2324, %v2735_v24   ;;  %v692_v43 = vpop.permute.xlu0 %691  ;;  %vm2885_vm8 = vmpackc.low %vm967_vm2, %vm966_vm11  ;;  %vm3223_vm2 = vcmask 261120   ;;  %vm1410_vm11 = vcmask 7168  }
 0x1c4   : > { %815 = vperm.xlu1 %2327, %v2735_v24   ;;  %vm3224_vm9 = vmmov %vm3223_vm2 }
 0x1c5   : > { %vm3225_vm14 = vmmov %vm3223_vm2 }
 0x1c7   : > { %2328 = vset.pattern.permute.xlu0 %v2426_v11  ;;  %v688_v32 = vpop.permute.xlu1 %687  ;;  %v696_v45 = vpop.permute.xlu0 %695 }
 0x1c8   : > { %2329 = vset.pattern.permute.xlu1 %v2424_v2  ;;  %819 = vperm.xlu0 %2328, %v2743_v25  }
 0x1c9   : > { %664 = vperm.xlu1 %2329, %v2730_v23  }
 0x1cc   : > { %2330 = vset.pattern.permute.xlu0 %v2424_v2  ;;  %v728_v34 = vpop.permute.xlu1 %727  ;;  %v740_v47 = vpop.permute.xlu0 %739 }
 0x1cd   : > { %669 = vperm.xlu1 %2329, %v2723_v22   ;;  %674 = vperm.xlu0 %2330, %v2735_v24  }
 0x1d0   : > { %v732_v36 = vpop.permute.xlu1 %731 }
 0x1d1   : > { %679 = vperm.xlu1 %2329, %v2743_v25   ;;  %v768_v23 = vpop.permute.xlu0 %767 }
 0x1d5   : > { %v700_v37 = vpop.permute.xlu1 %699 }
 0x1da   : > { %v772_v41 = vpop.permute.xlu1 %771 }
 0x1df   : > { %v736_v44 = vpop.permute.xlu1 %735 }
 0x1e4   : > { %v808_v46 = vpop.permute.xlu1 %807 }
 0x1e8   : > { %v812_v48 = vpop.permute.xlu1 %811 }
 0x225   : > { %v639_v50 = vpop.permute.xlu1 %638 }
 0x226   : > { %650 = vst.msk [vmem:[#allocation2] sm:$0xff] %vm381_vm1, %v639_v50 }
 0x229   : > { %v641_v22 = vpop.permute.xlu0 %640 }
 0x22a   : > { %651 = vst.msk [vmem:[#allocation2 + $0x8] sm:$0xff] %vm381_vm1, %v641_v22 }
 0x22d   : > { %v645_v24 = vpop.permute.xlu1 %644  ;;  %v2783_v25 = vld [vmem:[#allocation2] sm:$0xff] }
 0x22e   : > { %653 = vst.msk [vmem:[#allocation2 + $0x18] sm:$0xff] %vm381_vm1, %v645_v24  ;;  %v702_v52 = vmul.f32 %v688_v32, %v2783_v25  ;;  %v742_v56 = vmul.f32 %v728_v34, %v2783_v25  ;;  %v782_v0 = vmul.f32 %v768_v23, %v2783_v25  ;;  %v822_v7 = vmul.f32 %v808_v46, %v2783_v25 }
 0x22f   : > { %v2434_v32 = vmov 1.0|1.0  }
 0x230   : > { %710 = vrot.lane.b32.xlu1 %v702_v52, %s2430_s26  ;;  %2164 = vmatprep.subr.msk.bf16.mxu1 %vm2839_vm6, %v2434_v32 }
 0x231   : > { %v643_v53 = vpop.permute.xlu0 %642  ;;  %v2788_v54 = vld [vmem:[#allocation2 + $0x8] sm:$0xff]  ;;  %2166 = vmatpush3.bf16.msk.msra.mxu1 %vm2839_vm6, %v2434_v32 }
 0x232   : > { %652 = vst.msk [vmem:[#allocation2 + $0x10] sm:$0xff] %vm381_vm1, %v643_v53  ;;  %v703_v55 = vmul.f32 %v692_v43, %v2788_v54  ;;  %v743_v57 = vmul.f32 %v732_v36, %v2788_v54  ;;  %v783_v3 = vmul.f32 %v772_v41, %v2788_v54  ;;  %v823_v9 = vmul.f32 %v812_v48, %v2788_v54 }
 0x233   : > { %vm990_vm1 = vcmp.eq.s32.totalorder %v954_v60, %v984_v35  ;;  %2168 = vmatprep.subr.msk.bf16.mxu1 %vm2847_vm12, %v2434_v32  ;;  %v848_v35 = vld [vmem:[%s3199_s4 + $0x10] sm:$0xff] }
 0x234   : > { %712 = vrot.lane.b32.xlu0 %v703_v55, %s2430_s26  ;;  %750 = vrot.lane.b32.xlu1 %v742_v56, %s2431_s10  ;;  %vm2871_vm10 = vmpackc.low %vm990_vm1, %vm989_vm0  ;;  %vm1009_vm0 = vcmask 523264  }
 0x235   : > { %v2796_v58 = vld [vmem:[#allocation2 + $0x18] sm:$0xff]  ;;  %2170 = vmatpush3.bf16.msk.msra.mxu1 %vm2847_vm12, %v2434_v32  ;;  %vm3229_vm1 = vmmov %vm3223_vm2 }
 0x236   : > { %v705_v63 = vmul.f32 %v700_v37, %v2796_v58  ;;  %v745_v5 = vmul.f32 %v740_v47, %v2796_v58  ;;  %2172 = vmatprep.subr.msk.bf16.mxu1 %vm2867_vm7, %v2434_v32  ;;  %vm3230_vm3 = vmmov %vm3229_vm1 }
 0x237   : > { %vm3232_vm5 = vmmov %vm3229_vm1 }
 0x238   : > { %752 = vrot.lane.b32.xlu0 %v743_v57, %s2431_s10 }
 0x239   : > { %v2799_v59 = vld [vmem:[#allocation2 + $0x10] sm:$0xff]  ;;  %2174 = vmatpush3.bf16.msk.msra.mxu1 %vm2867_vm7, %v2434_v32 }
 0x23a   : > { %v704_v61 = vmul.f32 %v696_v45, %v2799_v59  ;;  %v744_v4 = vmul.f32 %v736_v44, %v2799_v59  ;;  %2176 = vmatprep.subr.msk.bf16.mxu1 %vm2885_vm8, %v2434_v32 }
 0x23c   : > { %714 = vrot.lane.b32.xlu1 %v704_v61, %s2430_s26  ;;  %716 = vrot.lane.b32.xlu0 %v705_v63, %s2430_s26 }
 0x23d   : > { %2178 = vmatpush3.bf16.msk.msra.mxu1 %vm2885_vm8, %v2434_v32 }
 0x23e   : > { %v780_v6 = vpop.permute.xlu1 %779  ;;  %2196 = vmatprep.subr.msk.bf16.mxu1 %vm2839_vm6, %v2434_v32 }
 0x23f   : > { %v785_v51 = vmul.f32 %v780_v6, %v2796_v58 }
 0x240   : > { %790 = vrot.lane.b32.xlu1 %v782_v0, %s2432_s12  ;;  %792 = vrot.lane.b32.xlu0 %v783_v3, %s2432_s12 }
 0x242   : > { %v776_v49 = vpop.permute.xlu0 %775 }
 0x243   : > { %v784_v15 = vmul.f32 %v776_v49, %v2799_v59  ;;  %v816_v16 = vpop.permute.xlu1 %815 }
 0x244   : > { %754 = vrot.lane.b32.xlu1 %v744_v4, %s2431_s10  ;;  %756 = vrot.lane.b32.xlu0 %v745_v5, %s2431_s10  ;;  %v824_v19 = vmul.f32 %v816_v16, %v2799_v59 }
 0x247   : > { %v820_v17 = vpop.permute.xlu0 %819 }
 0x248   : > { %830 = vrot.lane.b32.xlu1 %v822_v7, %s2433_s13  ;;  %832 = vrot.lane.b32.xlu0 %v823_v9, %s2433_s13  ;;  %v825_v20 = vmul.f32 %v820_v17, %v2796_v58  ;;  %v665_v46 = vpop.permute.xlu1 %664 }
 0x249   : > { %v682_v61 = vmul.f32 %v665_v46, %v2783_v25  ;;  %v849_v46 = vld [vmem:[%s3199_s4 + $0x18] sm:$0xff] }
 0x24c   : > { %794 = vrot.lane.b32.xlu1 %v784_v15, %s2432_s12  ;;  %796 = vrot.lane.b32.xlu0 %v785_v51, %s2432_s12  ;;  %v670_v47 = vpop.permute.xlu1 %669  ;;  %v675_v23 = vpop.permute.xlu0 %674 }
 0x24d   : > { %v683_v63 = vmul.f32 %v670_v47, %v2788_v54  ;;  %v684_v15 = vmul.f32 %v675_v23, %v2799_v59 }
 0x250   : > { %836 = vrot.lane.b32.xlu0 %v825_v20, %s2433_s13  ;;  %834 = vrot.lane.b32.xlu1 %v824_v19, %s2433_s13  ;;  %v680_v48 = vpop.permute.xlu1 %679 }
 0x251   : > { %v685_v16 = vmul.f32 %v680_v48, %v2796_v58  ;;  %v847_v58 = vld [vmem:[%s3199_s4 + $0x8] sm:$0xff] }
 0x2a2   : > { %v711_v50 = vpop.permute.xlu1 %710 }
 0x2a3   : > { %v722_v0 = vadd.f32 %v711_v50, %v682_v61  ;;  %v2435_v61 = vmov 0.0|0.0  }
 0x2a6   : > { %v713_v22 = vpop.permute.xlu0 %712  ;;  %v751_v24 = vpop.permute.xlu1 %750 }
 0x2a7   : > { %v723_v3 = vadd.f32 %v713_v22, %v683_v63  ;;  %v762_v6 = vadd.f32 %v751_v24, %v722_v0 }
 0x2aa   : > { %v753_v52 = vpop.permute.xlu0 %752 }
 0x2ab   : > { %v763_v49 = vadd.f32 %v753_v52, %v723_v3 }
 0x2ae   : > { %v717_v53 = vpop.permute.xlu0 %716  ;;  %v715_v55 = vpop.permute.xlu1 %714 }
 0x2af   : > { %v725_v20 = vadd.f32 %v717_v53, %v685_v16  ;;  %v724_v25 = vadd.f32 %v715_v55, %v684_v15 }
 0x2b2   : > { %v793_v56 = vpop.permute.xlu0 %792  ;;  %v791_v57 = vpop.permute.xlu1 %790 }
 0x2b3   : > { %v803_v7 = vadd.f32 %v793_v56, %v763_v49  ;;  %v802_v9 = vadd.f32 %v791_v57, %v762_v6 }
 0x2b6   : > { %v757_v4 = vpop.permute.xlu0 %756  ;;  %v755_v5 = vpop.permute.xlu1 %754 }
 0x2b7   : > { %v765_v31 = vadd.f32 %v757_v4, %v725_v20  ;;  %v764_v30 = vadd.f32 %v755_v5, %v724_v25 }
 0x2ba   : > { %v833_v10 = vpop.permute.xlu0 %832  ;;  %v831_v51 = vpop.permute.xlu1 %830 }
 0x2bb   : > { %v843_v17 = vadd.f32 %v833_v10, %v803_v7  ;;  %v842_v19 = vadd.f32 %v831_v51, %v802_v9 }
 0x2bd   : > { %v2155_v21 = vpack.c.bf16 %v843_v17, %v842_v19 }
 0x2be   : > { %v797_v54 = vpop.permute.xlu0 %796  ;;  %v795_v27 = vpop.permute.xlu1 %794 }
 0x2bf   : > { %2156 = vmatprep.subr.bf16.mxu0 %v2155_v21  ;;  %v805_v33 = vadd.f32 %v797_v54, %v765_v31  ;;  %v804_v38 = vadd.f32 %v795_v27, %v764_v30 }
 0x2c0   : > { %2158 = vmatpush3.bf16.msra.mxu0 %v2155_v21 }
 0x2c2   : > { %v837_v40 = vpop.permute.xlu0 %836  ;;  %v835_v60 = vpop.permute.xlu1 %834 }
 0x2c3   : > { %v845_v28 = vadd.f32 %v837_v40, %v805_v33  ;;  %v844_v39 = vadd.f32 %v835_v60, %v804_v38 }
 0x2c5   : > { %v2159_v59 = vpack.c.bf16 %v845_v28, %v844_v39 }
 0x2c7   : > { %2160 = vmatprep.subr.bf16.mxu0 %v2159_v59 }
 0x2c8   : > { %2162 = vmatpush3.bf16.msra.mxu0 %v2159_v59 }
 0x2c9   : > { %2180 = vmatprep.subr.msk.bf16.mxu0 %vm2851_vm15, %v2434_v32 }
 0x2cb   : > { %2043 = vmatmul.mubr.msk.f32.vlgmr.msra.gmra.mrb[0].mxu0 %vm3223_vm2, %v847_v58 }
 0x2cc   : > { %2045 = vmatprep.mubr.msk.f32.mxu0 %vm3224_vm9, %v848_v35  ;;  %2182 = vmatpush3.bf16.msk.msra.mxu0 %vm2851_vm15, %v2434_v32  ;;  %v1415_v35 = vld [vmem:[%s3200_s5] sm:$0x3]  ;;  %vm1692_vm9 = vcmask 304128  }
 0x2cd   : > { %2184 = vmatprep.subr.msk.bf16.mxu0 %vm2861_vm4, %v2434_v32  ;;  %1693 = vst.msk [vmem:[#allocation3] sm:$0x3] %vm1692_vm9, %v2428_v13 }
 0x2cf   : > { %2046 = vmatmul.mubr.msk.f32.gmra.mrb[2].mxu0 %vm3225_vm14, %v849_v46  ;;  %v1490_v46 = vld [vmem:[%s3201_s6] sm:$0xff]  ;;  %vm3235_vm14 = vmmov %vm3229_vm1 }
 0x2d0   : > { %2186 = vmatpush3.bf16.msk.msra.mxu0 %vm2861_vm4, %v2434_v32 }
 0x2d1   : > { %2188 = vmatprep.subr.msk.bf16.mxu0 %vm2871_vm10, %v2434_v32 }
 0x2d4   : > { %2190 = vmatpush3.bf16.msk.msra.mxu0 %vm2871_vm10, %v2434_v32 }
 0x2d5   : > { %2192 = vmatprep.subr.msk.bf16.mxu0 %vm2881_vm13, %v2434_v32 }
 0x2d8   : > { %2194 = vmatpush3.bf16.msk.msra.mxu0 %vm2881_vm13, %v2434_v32 }
 0x2d9   : > { %2212 = vmatprep.subr.msk.bf16.mxu0 %vm2851_vm15, %v2434_v32 }
 0x39e   : > { %v2044_v47 = vpop.f32.mrb[0].mxu0 }
 0x39f   : > { %v929_v48 = vpop.f32.mrb[1].mxu0 }
 0x3a0   : > { %2064 = vmatprep.mubr.msk.f32.mxu1 %vm1009_vm0, %v929_v48  ;;  %2086 = vmatprep.mubr.msk.f32.mxu0 %vm1009_vm0, %v929_v48 }
 0x3a1   : > { %2065 = vmatmul.mubr.msk.f32.vlgmr.msra.gmra.mrb[0].mxu1 %vm1009_vm0, %v2044_v47  ;;  %2087 = vmatmul.mubr.msk.f32.vlgmr.msra.gmra.mrb[4].mxu0 %vm1009_vm0, %v2044_v47 }
 0x3a2   : > { %v2047_v23 = vpop.f32.mrb[2].mxu0  ;;  %2198 = vmatpush3.bf16.msk.msra.mxu1 %vm2839_vm6, %v2434_v32  ;;  %2214 = vmatpush3.bf16.msk.msra.mxu0 %vm2851_vm15, %v2434_v32  ;;  %vm3226_vm6 = vmmov %vm3223_vm2 }
 0x3a3   : > { %v939_v50 = vpop.f32.mrb[3].mxu0  ;;  %2200 = vmatprep.subr.msk.bf16.mxu1 %vm2847_vm12, %v2434_v32  ;;  %2216 = vmatprep.subr.msk.bf16.mxu0 %vm2861_vm4, %v2434_v32  ;;  %vm3228_vm15 = vmmov %vm3223_vm2 }
 0x3a4   : > { %2067 = vmatprep.mubr.msk.f32.mxu1 %vm1009_vm0, %v939_v50  ;;  %2089 = vmatprep.mubr.msk.f32.mxu0 %vm1009_vm0, %v939_v50  ;;  %v1491_v50 = vld [vmem:[%s3201_s6 + $0x8] sm:$0xff] }
 0x3a5   : > { %2068 = vmatmul.mubr.msk.f32.gmra.mrb[2].mxu1 %vm1009_vm0, %v2047_v23  ;;  %2090 = vmatmul.mubr.msk.f32.gmra.mrb[6].mxu0 %vm1009_vm0, %v2047_v23 }
 0x3a6   : > { %2202 = vmatpush3.bf16.msk.msra.mxu1 %vm2847_vm12, %v2434_v32  ;;  %2218 = vmatpush3.bf16.msk.msra.mxu0 %vm2861_vm4, %v2434_v32  ;;  %vm3227_vm12 = vmmov %vm3223_vm2  ;;  %vm1507_vm2 = vcmask 1041408  }
 0x3a7   : > { %2204 = vmatprep.subr.msk.bf16.mxu1 %vm2867_vm7, %v2434_v32  ;;  %2220 = vmatprep.subr.msk.bf16.mxu0 %vm2871_vm10, %v2434_v32  ;;  %vm3231_vm4 = vmmov %vm3229_vm1 }
 0x3a8   : > { %2108 = vmatprep.mubr.msk.f32.mxu1 %vm1009_vm0, %v2621_v14  ;;  %2130 = vmatprep.mubr.msk.f32.mxu0 %vm1009_vm0, %v2621_v14 }
 0x3aa   : > { %2206 = vmatpush3.bf16.msk.msra.mxu1 %vm2867_vm7, %v2434_v32  ;;  %2222 = vmatpush3.bf16.msk.msra.mxu0 %vm2871_vm10, %v2434_v32  ;;  %vm3233_vm7 = vmmov %vm3229_vm1  ;;  %vm2436_vm10 = vmmov 0  }
 0x3ab   : > { %2208 = vmatprep.subr.msk.bf16.mxu1 %vm2885_vm8, %v2434_v32  ;;  %2224 = vmatprep.subr.msk.bf16.mxu0 %vm2881_vm13, %v2434_v32 }
 0x3ae   : > { %2210 = vmatpush3.bf16.msk.msra.mxu1 %vm2885_vm8, %v2434_v32  ;;  %2226 = vmatpush3.bf16.msk.msra.mxu0 %vm2881_vm13, %v2434_v32  ;;  %vm3234_vm13 = vmmov %vm3229_vm1  ;;  %vm1494_vm8 = vcmask 15360  }
 0x3af   : > { %2227 = vmatprep.subr.bf16.mxu1 %v2435_v61 }
 0x3b1   : > { %2109 = vmatmul.mubr.msk.f32.vlgmr.msra.gmra.mrb[4].mxu1 %vm1009_vm0, %v2624_v18  ;;  %2131 = vmatmul.mubr.msk.f32.vlgmr.msra.gmra.mrb[8].mxu0 %vm1009_vm0, %v2624_v18 }
 0x3b2   : > { %2111 = vmatprep.mubr.msk.f32.mxu1 %vm1009_vm0, %v2628_v26  ;;  %2133 = vmatprep.mubr.msk.f32.mxu0 %vm1009_vm0, %v2628_v26 }
 0x3b5   : > { %2112 = vmatmul.mubr.msk.f32.gmra.mrb[6].mxu1 %vm1009_vm0, %v2630_v29  ;;  %2134 = vmatmul.mubr.msk.f32.gmra.mrb[10].mxu0 %vm1009_vm0, %v2630_v29  ;;  %vm3236_vm0 = vmmov %vm3229_vm1 }
 0x3b6   : > { %2144 = vmatprep.mubr.msk.f32.mxu1 %vm2436_vm10, %v2428_v13  ;;  %vm3244_vm10 = vmmov %vm3236_vm0 }
 0x474   : > { %v2066_v14 = vpop.f32.mrb[0].mxu1  ;;  %v2088_v42 = vpop.f32.mrb[4].mxu0 }
 0x475   : > { %v3010_v32 = vmax.f32 %v2066_v14, %v2088_v42  ;;  %v1088_v34 = vpop.f32.mrb[1].mxu1  ;;  %v1173_v36 = vpop.f32.mrb[5].mxu0  ;;  %v1492_v14 = vld [vmem:[%s3201_s6 + $0x10] sm:$0xff]  ;;  %v1493_v42 = vld [vmem:[%s3201_s6 + $0x18] sm:$0xff] }
 0x476   : > { %v3012_v37 = vmax.f32 %v1088_v34, %v1173_v36 }
 0x477   : > { %v1401_v18 = vsel %vm3226_vm6, %v3010_v32, -inf  ;;  %v1385_v26 = vsel %vm3227_vm12, %v3010_v32, 0.0  ;;  %vm3237_vm6 = vmmov %vm3236_vm0 }
 0x478   : > { %1402 = vmax.xlane.f32.xlu1 %v1401_v18  ;;  %1386 = vadd.xlane.f32.xlu0 %v1385_v26  ;;  %v2069_v41 = vpop.f32.mrb[2].mxu1  ;;  %v2091_v43 = vpop.f32.mrb[6].mxu0  ;;  %v1398_v24 = vsel %vm3228_vm15, %v3012_v37, -inf  ;;  %v1382_v52 = vsel %vm3229_vm1, %v3012_v37, 0.0  ;;  %vm3238_vm12 = vmmov %vm3236_vm0 }
 0x479   : > { %v3018_v44 = vmax.f32 %v2069_v41, %v2091_v43  ;;  %v1098_v29 = vpop.f32.mrb[3].mxu1  ;;  %v1183_v45 = vpop.f32.mrb[7].mxu0  ;;  %vm3239_vm15 = vmmov %vm3236_vm0 }
 0x47a   : > { %v3020_v22 = vmax.f32 %v1098_v29, %v1183_v45  ;;  %vm3240_vm1 = vmmov %vm3236_vm0 }
 0x47b   : > { %v1391_v53 = vsel %vm3230_vm3, %v3018_v44, 0.0  ;;  %v1407_v56 = vsel %vm3232_vm5, %v3018_v44, -inf  ;;  %vm3241_vm3 = vmmov %vm3236_vm0  ;;  %vm1698_vm5 = vcmask 278552  }
 0x47c   : > { %1399 = vmax.xlane.f32.xlu0 %v1398_v24  ;;  %1383 = vadd.xlane.f32.xlu1 %v1382_v52  ;;  %v1388_v55 = vsel %vm3231_vm4, %v3020_v22, 0.0  ;;  %v1404_v57 = vsel %vm3233_vm7, %v3020_v22, -inf  ;;  %vm3242_vm4 = vmmov %vm3236_vm0 }
 0x47d   : > { %vm3243_vm7 = vmmov %vm3236_vm0 }
 0x480   : > { %1392 = vadd.xlane.f32.xlu1 %v1391_v53  ;;  %1389 = vadd.xlane.f32.xlu0 %v1388_v55 }
 0x484   : > { %1408 = vmax.xlane.f32.xlu1 %v1407_v56  ;;  %1405 = vmax.xlane.f32.xlu0 %v1404_v57  ;;  %v3035_v63 = vpop.f32.mrb[4].mxu1  ;;  %v3037_v0 = vpop.f32.mrb[8].mxu0 }
 0x485   : > { %v1379_v3 = vmax.f32 %v3035_v63, %v3037_v0  ;;  %v3041_v4 = vpop.f32.mrb[5].mxu1  ;;  %v3043_v5 = vpop.f32.mrb[9].mxu0 }
 0x486   : > { %v1378_v6 = vmax.f32 %v3041_v4, %v3043_v5 }
 0x488   : > { %v3047_v49 = vpop.f32.mrb[6].mxu1  ;;  %v3049_v7 = vpop.f32.mrb[10].mxu0 }
 0x489   : > { %v1381_v9 = vmax.f32 %v3047_v49, %v3049_v7  ;;  %v3053_v10 = vpop.f32.mrb[7].mxu1  ;;  %v3055_v51 = vpop.f32.mrb[11].mxu0 }
 0x48a   : > { %v1380_v15 = vmax.f32 %v3053_v10, %v3055_v51 }
 0x505   : > { %v1403_v16 = vpop.xlane.xlu1 %1402  ;;  %v1387_v17 = vpop.xlane.xlu0 %1386 }
 0x506   : > { %v1395_v19 = vmul.f32 0.03125, %v1387_v17 }
 0x508   : > { %v1412_v54 = vsel %vm1410_vm11, %v1395_v19, %v1403_v16 }
 0x509   : > { %v1400_v20 = vpop.xlane.xlu0 %1399  ;;  %v1384_v25 = vpop.xlane.xlu1 %1383 }
 0x50a   : > { %v1394_v21 = vmul.f32 0.03125, %v1384_v25 }
 0x50c   : > { %v1411_v27 = vsel %vm1410_vm11, %v1394_v21, %v1400_v20 }
 0x50d   : > { %v2228_v31 = vpack.c.bf16 %v1412_v54, %v1411_v27  ;;  %v1393_v30 = vpop.xlane.xlu1 %1392  ;;  %v1390_v33 = vpop.xlane.xlu0 %1389 }
 0x50e   : > { %v1397_v38 = vmul.f32 0.03125, %v1393_v30  ;;  %v1396_v40 = vmul.f32 0.03125, %v1390_v33 }
 0x50f   : > { %2229 = vmatpush3.bf16.msra.mxu1 %v2228_v31 }
 0x510   : > { %2230 = vmatprep.subr.bf16.mxu1 %v2435_v61 }
 0x511   : > { %v1409_v60 = vpop.xlane.xlu1 %1408  ;;  %v1406_v28 = vpop.xlane.xlu0 %1405 }
 0x512   : > { %v1414_v39 = vsel %vm1410_vm11, %v1397_v38, %v1409_v60  ;;  %v1413_v59 = vsel %vm1410_vm11, %v1396_v40, %v1406_v28  ;;  %v1705_v60 = vld [vmem:[%s3202_s7] sm:$0x3]  ;;  %vm3245_vm11 = vmmov %vm3236_vm0 }
 0x513   : > { %v2231_v58 = vpack.c.bf16 %v1414_v39, %v1413_v59 }
 0x515   : > { %2232 = vmatpush3.bf16.msra.mxu1 %v2231_v58 }
 0x518   : > { %2145 = vmatmul.mubr.msk.f32.vlgmr.msra.gmra.mrb[8].mxu1 %vm3234_vm13, %v1415_v35  ;;  %vm3246_vm13 = vmmov %vm3236_vm0 }
 0x519   : > { %2149 = vmatprep.mubr.msk.f32.mxu1 %vm1494_vm8, %v1490_v46 }
 0x5eb   : > { %v1485_v47 = vpop.f32.mrb[8].mxu1 }
 0x5ec   : > { %v1489_v48 = vmax.f32 %v1485_v47, 0.0  ;;  %v2146_v23 = vpop.f32.mrb[9].mxu1 }
 0x5ee   : > { %2147 = vmatprep.subr.msk.mxu1 %vm1507_vm2, %v1489_v48 }
 0x5ef   : > { %2148 = vmatpush3.msk.msra.mxu1 %vm1507_vm2, %v1489_v48 }
 0x5f0   : > { %2150 = vmatmul.mubr.msk.f32.vlgmr.msra.gmra.mrb[10].mxu1 %vm1494_vm8, %v1491_v50 }
 0x5f1   : > { %2152 = vmatprep.mubr.msk.f32.mxu1 %vm1494_vm8, %v1492_v14 }
 0x5f4   : > { %2153 = vmatmul.mubr.msk.f32.gmra.mrb[12].mxu1 %vm1494_vm8, %v1493_v42 }
 0x6c3   : > { %v2151_v34 = vpop.f32.mrb[10].mxu1 }
 0x6c4   : > { %1602 = vrot.lane.b32.xlu1 %v2151_v34, %s2430_s26  ;;  %v1577_v36 = vpop.f32.mrb[11].mxu1 }
 0x6c5   : > { %1600 = vrot.lane.b32.xlu0 %v1577_v36, %s2430_s26 }
 0x6c7   : > { %v2154_v18 = vpop.f32.mrb[12].mxu1 }
 0x6c8   : > { %v1587_v26 = vpop.f32.mrb[13].mxu1 }
 0x6c9   : > { %1606 = vrot.lane.b32.xlu0 %v2154_v18, %s2430_s26  ;;  %1604 = vrot.lane.b32.xlu1 %v1587_v26, %s2430_s26 }
 0x736   : > { %v1603_v41 = vpop.permute.xlu1 %1602 }
 0x737   : > { %v1613_v43 = vadd.f32 %v2151_v34, %v1603_v41  ;;  %v1601_v29 = vpop.permute.xlu0 %1600 }
 0x738   : > { %v1612_v45 = vadd.f32 %v1601_v29, %v1577_v36 }
 0x739   : > { %v1957_v24 = vmul.f32 -1.442695, %v1613_v43 }
 0x73a   : > { %v1956_v52 = vmul.f32 -1.442695, %v1612_v45 }
 0x73b   : > { %2339 = vpow2.f32 %v1957_v24  ;;  %v1607_v53 = vpop.permute.xlu0 %1606  ;;  %v1605_v55 = vpop.permute.xlu1 %1604 }
 0x73c   : > { %2341 = vpow2.f32 %v1956_v52  ;;  %v1615_v56 = vadd.f32 %v2154_v18, %v1607_v53  ;;  %v1614_v57 = vadd.f32 %v1605_v55, %v1587_v26 }
 0x73e   : > { %v1959_v61 = vmul.f32 -1.442695, %v1615_v56  ;;  %v1958_v16 = vmul.f32 -1.442695, %v1614_v57 }
 0x740   : > { %2343 = vpow2.f32 %v1959_v61 }
 0x741   : > { %2345 = vpow2.f32 %v1958_v16  ;;  %v2438_v16 = vmov 5  }
 0x745   : > { %v2340_v17 = vpop.eup %2339 }
 0x746   : > { %v2342_v19 = vpop.eup %2341  ;;  %v1629_v20 = vadd.f32 1.0, %v2340_v17  ;;  %v2439_v17 = vmov 6  }
 0x747   : > { %v1628_v25 = vadd.f32 1.0, %v2342_v19 }
 0x748   : > { %2347 = vrcp.f32 %v1629_v20 }
 0x749   : > { %2349 = vrcp.f32 %v1628_v25 }
 0x74a   : > { %v2344_v21 = vpop.eup %2343 }
 0x74b   : > { %v2346_v54 = vpop.eup %2345  ;;  %v1631_v27 = vadd.f32 1.0, %v2344_v21 }
 0x74c   : > { %v1630_v31 = vadd.f32 1.0, %v2346_v54 }
 0x74d   : > { %2351 = vrcp.f32 %v1631_v27 }
 0x74e   : > { %2353 = vrcp.f32 %v1630_v31 }
 0x752   : > { %v2348_v30 = vpop.eup %2347 }
 0x753   : > { %v2350_v33 = vpop.eup %2349  ;;  %1647 = vperm.xlu0 %2330, %v2348_v30  }
 0x754   : > { %1642 = vperm.xlu1 %2329, %v2350_v33  }
 0x757   : > { %v2352_v38 = vpop.eup %2351 }
 0x758   : > { %v2354_v40 = vpop.eup %2353  ;;  %1657 = vperm.xlu0 %2330, %v2352_v38  }
 0x759   : > { %1652 = vperm.xlu1 %2329, %v2354_v40  }
 0x75c   : > { %2332 = vset.pattern.permute.xlu0 %v2425_v8 }
 0x75d   : > { %2331 = vset.pattern.permute.xlu1 %v2423_v1 }
 0x75e   : > { %1714 = vperm.xlu1 %2331, %v1705_v60  }
 0x762   : > { %2333 = vset.pattern.permute.xlu1 %v2427_v12 }
 0x7d2   : > { %v1648_v28 = vpop.permute.xlu0 %1647 }
 0x7d3   : > { %v3091_v39 = vmul.f32 %v1648_v28, %v3010_v32  ;;  %v1643_v59 = vpop.permute.xlu1 %1642 }
 0x7d4   : > { %v3094_v58 = vmul.f32 %v1643_v59, %v3012_v37 }
 0x7d5   : > { %v1665_v35 = vsel %vm3235_vm14, %v3091_v39, 0.0  ;;  %v1680_v13 = vsel %vm3237_vm6, %v3091_v39, -inf }
 0x7d6   : > { %v1664_v1 = vsel %vm3236_vm0, %v3094_v58, 0.0  ;;  %v1679_v32 = vsel %vm3238_vm12, %v3094_v58, -inf }
 0x7d7   : > { %v1658_v8 = vpop.permute.xlu0 %1657  ;;  %v1666_v47 = vadd.f32 %v1665_v35, %v1664_v1  ;;  %v1683_v50 = vmax.f32 %v1679_v32, %v1680_v13 }
 0x7d8   : > { %v3101_v12 = vmul.f32 %v1658_v8, %v3018_v44  ;;  %v1653_v46 = vpop.permute.xlu1 %1652 }
 0x7d9   : > { %v3108_v37 = vmul.f32 %v1653_v46, %v3020_v22 }
 0x7da   : > { %v1682_v48 = vsel %vm3239_vm15, %v3101_v12, -inf  ;;  %v1669_v34 = vsel %vm3242_vm4, %v3101_v12, 0.0 }
 0x7db   : > { %v1667_v23 = vsel %vm3240_vm1, %v3108_v37, 0.0  ;;  %v1681_v44 = vsel %vm3241_vm3, %v3108_v37, -inf }
 0x7dc   : > { %v1668_v14 = vadd.f32 %v1667_v23, %v1666_v47  ;;  %v1684_v42 = vmax.f32 %v1681_v44, %v1682_v48 }
 0x7dd   : > { %v1715_v19 = vpop.permute.xlu1 %1714 }
 0x7de   : > { %v1670_v36 = vadd.f32 %v1669_v34, %v1668_v14  ;;  %v1685_v18 = vmax.f32 %v1683_v50, %v1684_v42 }
 0x7e0   : > { %v1671_v22 = vrot.slane %v1670_v36, 4  ;;  %v1686_v26 = vrot.slane %v1685_v18, 4 }
 0x7e2   : > { %v1672_v41 = vadd.f32 %v1671_v22, %v1670_v36  ;;  %v1687_v43 = vmax.f32 %v1685_v18, %v1686_v26 }
 0x7e4   : > { %v1688_v29 = vrot.slane %v1687_v43, 2  ;;  %v1673_v45 = vrot.slane %v1672_v41, 2 }
 0x7e6   : > { %v1689_v24 = vmax.f32 %v1687_v43, %v1688_v29  ;;  %v1674_v52 = vadd.f32 %v1673_v45, %v1672_v41  ;;  %v1785_v41 = vsub.s32 0, %v2829_v62 }
 0x7e8   : > { %v1690_v53 = vrot.slane %v1689_v24, 1  ;;  %v1675_v55 = vrot.slane %v1674_v52, 1 }
 0x7ea   : > { %v1691_v56 = vmax.f32 %v1689_v24, %v1690_v53  ;;  %v1676_v57 = vadd.f32 %v1675_v55, %v1674_v52 }
 0x7ec   : > { %1701 = vrot.lane.b32.xlu0 %v1691_v56, %s2437_s18  ;;  %v1678_v61 = vmul.f32 0.03125, %v1676_v57 }
 0x7ee   : > { %1695 = vrot.lane.b32.xlu1 %v1678_v61, %s2437_s18  ;;  %s2363_s18 = sshll.u32 %s2442_s17, 4  ;;  %s2364_s18 = int_to_ptr.vmem [resolvable:$false] %s2363_s18 }
 0x7f0   : > { %1724 = vperm.xlu0 %2332, %v1705_v60  }
 0x7f2   : > { %1734 = vperm.xlu1 %2333, %v1705_v60  }
 0x7f4   : > { %2335 = vset.pattern.permute.xlu0 %v2438_v16 }
 0x7f5   : > { %1754 = vperm.xlu0 %2335, %v1705_v60  }
 0x7f6   : > { %2334 = vset.pattern.permute.xlu1 %v2426_v11 }
 0x7f7   : > { %1744 = vperm.xlu1 %2334, %v1705_v60  }
 0x7f9   : > { %2338 = vset.pattern.permute.xlu0 %v2439_v17 }
 0x7fb   : > { %2336 = vset.pattern.permute.xlu1 %v2439_v17 }
 0x7fc   : > { %1764 = vperm.xlu1 %2336, %v1705_v60  }
 0x800   : > { %2337 = vset.pattern.permute.xlu1 %v2424_v2 }
 0x801   : > { %1709 = vperm.xlu1 %2337, %v1705_v60  }
 0x85e   : > { %v1702_v20 = vpop.permute.xlu0 %1701 }
 0x85f   : > { %1704 = vst.msk [vmem:[#allocation3 + $0x1] sm:$0x1] %vm1698_vm5, %v1702_v20 }
 0x860   : > { %v1696_v25 = vpop.permute.xlu1 %1695 }
 0x861   : > { %1699 = vst.msk [vmem:[#allocation3] sm:$0x1] %vm1698_vm5, %v1696_v25 }
 0x868   : > { %v1706_v21 = vld [vmem:[#allocation3] sm:$0x3] }
 0x869   : > { %v1717_v54 = vmul.f32 %v1715_v19, %v1706_v21 }
 0x86b   : > { %1719 = vrot.lane.b32.xlu0 %v1717_v54, %s2430_s26  ;;  %s296_s26 = sand.u32 1, %s2413_s28  }
 0x86f   : > { %v1725_v27 = vpop.permute.xlu0 %1724 }
 0x870   : > { %v1727_v11 = vmul.f32 %v1725_v27, %v1706_v21 }
 0x871   : > { %v1735_v31 = vpop.permute.xlu1 %1734 }
 0x872   : > { %v1737_v30 = vmul.f32 %v1735_v31, %v1706_v21  ;;  %1729 = vrot.lane.b32.xlu1 %v1727_v11, %s2431_s10  ;;  %s1879_s10 = sshll.u32 %s296_s26, 5 }
 0x874   : > { %v1755_v33 = vpop.permute.xlu0 %1754  ;;  %1739 = vrot.lane.b32.xlu0 %v1737_v30, %s2432_s12  ;;  %s1967_s12 = sshll.u32 %s2511_s9, 9  ;;  %s3154_s9 = scalar_lea.sflag [#allocation5], %s296_s26 }
 0x875   : > { %v1757_v2 = vmul.f32 %v1755_v33, %v1706_v21  ;;  %s3134_s24 = scalar_lea.hbm %s3203_s8, %s1967_s12 }
 0x876   : > { %v1745_v38 = vpop.permute.xlu1 %1744 }
 0x877   : > { %v1747_v40 = vmul.f32 %v1745_v38, %v1706_v21 }
 0x878   : > { %1759 = vrot.lane.b32.xlu0 %v1757_v2, %s2440_s19  ;;  %s2365_s19 = scalar_lea.vmem %s2364_s18, 1024 }
 0x879   : > { %1749 = vrot.lane.b32.xlu1 %v1747_v40, %s2433_s13  ;;  %s298_s13 = scalar_lea.vmem [#allocation4], %s1879_s10 }
 0x87a   : > { %s1813_s21 = sshll.u32 %s298_s13, 4  ;;  %s3136_s21 = int_to_ptr.vmem [resolvable:$true] %s1813_s21 }
 0x87b   : > { %v1765_v60 = vpop.permute.xlu1 %1764  ;;  %s2359_s25 = scalar_lea.vmem %s3136_s21, 512  ;;  %p2366_p0 = scmp.lt.s32.totalorder %s3136_s21, %s2364_s18 }
 0x87c   : > { %v1767_v28 = vmul.f32 %v1765_v60, %v1706_v21  ;;  %p2360_p11 = scmp.ne.s32.totalorder %s3136_s21, %s2359_s25  ;;  %p2367_p1 = scmp.lt.s32.totalorder %s2365_s19, %s2359_s25 }
 0x87e   : > { %1769 = vrot.lane.b32.xlu1 %v1767_v28, %s2441_s20  ;;  %p2361_p12 = pnand %p2360_p11, %p2528_p5  ;;  %p2368_p2 = por %p2367_p1, %p2366_p0 }
 0x880   : > { %v1710_v59 = vpop.permute.xlu1 %1709  ;;  %p2362_p13 = pneg %p2361_p12 }
 0x881   : > { %v1712_v1 = vmul.f32 %v1710_v59, %v1706_v21 }
 0x882   : > { %p2369_p3 = pnand %p2368_p2, %p2362_p13 }
 0x8dd   : > { %v1720_v35 = vpop.permute.xlu0 %1719 }
 0x8de   : > { %v1722_v8 = vadd.f32 %v1720_v35, %v1712_v1 }
 0x8e4   : > { %v1730_v46 = vpop.permute.xlu1 %1729 }
 0x8e5   : > { %v1732_v13 = vadd.f32 %v1730_v46, %v1722_v8 }
 0x8e6   : > { %v1740_v32 = vpop.permute.xlu0 %1739 }
 0x8e7   : > { %v1742_v47 = vadd.f32 %v1740_v32, %v1732_v13 }
 0x8ea   : > { %v1760_v44 = vpop.permute.xlu0 %1759 }
 0x8eb   : > { %v1750_v48 = vpop.permute.xlu1 %1749 }
 0x8ec   : > { %v1752_v23 = vadd.f32 %v1750_v48, %v1742_v47 }
 0x8ee   : > { %v1762_v50 = vadd.f32 %v1760_v44, %v1752_v23 }
 0x8f0   : > { %v1770_v14 = vpop.permute.xlu1 %1769 }
 0x8f1   : > { %v1772_v42 = vadd.f32 %v1770_v14, %v1762_v50 }
 0x8f3   : > { %v1774_v34 = vrot.slane %v1772_v42, 1 }
 0x8f5   : > { %v1776_v36 = vadd.f32 %v1774_v34, %v1772_v42 }
 0x8f7   : > { %v1960_v18 = vmul.f32 -1.442695, %v1776_v36 }
 0x8f9   : > { %2355 = vpow2.f32 %v1960_v18 }
 0x903   : > { %v2356_v22 = vpop.eup %2355 }
 0x904   : > { %v1780_v26 = vadd.f32 1.0, %v2356_v22 }
 0x906   : > { %2357 = vrcp.f32 %v1780_v26 }
 0x910   : > { %v2358_v43 = vpop.eup %2357 }
 0x911   : > { %v1786_v29 = vrot.slane %v2358_v43, %v1785_v41 }
 0x913   : > { %v1787_v45 = vmul.f32 %v1786_v29, %v3094_v58  ;;  %v1788_v24 = vmul.f32 %v1786_v29, %v3091_v39  ;;  %v1789_v52 = vmul.f32 %v1786_v29, %v3108_v37  ;;  %v1790_v53 = vmul.f32 %v1786_v29, %v3101_v12 }
 0x915   : > { %v1791_v62 = vadd.f32 %v1787_v45, %v1378_v6  ;;  %v1792_v39 = vadd.f32 %v1788_v24, %v1379_v3  ;;  %v1793_v58 = vadd.f32 %v1789_v52, %v1380_v15  ;;  %v1794_v12 = vadd.f32 %v1790_v53, %v1381_v9 }
 0x917   : > { %1795 = vst.msk [vmem:[%s298_s13] sm:$0xff] %vm3243_vm7, %v1791_v62 }
 0x918   : > { %1796 = vst.msk [vmem:[%s298_s13 + $0x8] sm:$0xff] %vm3244_vm10, %v1792_v39 }
 0x919   : > { %1797 = vst.msk [vmem:[%s298_s13 + $0x10] sm:$0xff] %vm3245_vm11, %v1793_v58 }
 0x91a   : > { %1798 = vst.msk [vmem:[%s298_s13 + $0x18] sm:$0xff] %vm3246_vm13, %v1794_v12 }
 0x91b   : > { %2372 = shalt.err (!%p2369_p3)
}
 0x91c   : > { %s2373_s20 = scalar_lea.hbm %s3134_s24, 512  ;;  %s2377_s12 = scalar_lea.hbm %s3203_s8, 1024 }
 0x91d   : > { %p2374_p4 = scmp.ne.s32.totalorder %s3134_s24, %s2373_s20  ;;  %p2378_p9 = scmp.lt.u32.totalorder %s3134_s24, %s3203_s8 }
 0x91e   : > { %p2379_p10 = scmp.lt.u32.totalorder %s2377_s12, %s2373_s20  ;;  %p2381_p12 = scmp.lt.u32.totalorder %s2373_s20, %s3134_s24 }
 0x91f   : > { %p2375_p7 = pnand %p2374_p4, %p2528_p5 }
 0x920   : > { %p2380_p11 = por %p2379_p10, %p2378_p9 }
 0x921   : > { %p2376_p8 = pneg %p2375_p7 }
 0x922   : > { %p2382_p13 = por %p2381_p12, %p2380_p11 }
 0x924   : > { %p2383_p0 = pnand %p2382_p13, %p2376_p8 }
 0x926   : > { %2386 = shalt.err (!%p2383_p0)
}
 0x927   : > { %s2443_s23 = smov 128   ;;  %s2444_s25 = smov 8  }
 0x928   : > { %2233 = dma.vmem_to_hbm [thread:$0]  (%p2528_p5), %s3136_s21, 512, %s3134_s24, %s3154_s9, %s2443_s23, %s2443_s23, %s2444_s25  }
 0x929 PF: > { %p2239_p1 = scmp.ge.s32.totalorder %s2421_s30, 2  ;;  %s1828_s17 = sand.u32 1, %s2409_s27  }
 0x92a   : > { %s1829_s18 = scalar_lea.sflag [#allocation5], %s1828_s17 }
 0x92b   : > { %p2236_p2 = pnand %p2239_p1, %p2532_p6 }
 0x92d   : > { %2404 = dma.done.wait (!%p2236_p2), %s1829_s18, 512  }
 0x92e   : > { %2406 = vsyncadd (!%p2236_p2), %s1829_s18, 4294966784  ;;  %p18_p3 = scmp.ge.s32.totalorder %s2515_s11, 4   ;;  %s3247_s27 = smov %s2413_s28 }
 0x92f   : > { %s3248_s28 = smov %s2417_s29  ;;  %s3249_s29 = smov %s2526_s14 }
 0x930   : > { %s3250_s30 = smov %s2515_s11  ;;  %20 = sbr.rel (!%p18_p3) target bundleno = 3 (0x3), region = 87 }
 0x937   :  { %1834 = vsyncpa [#allocation5], 1 }
 0x938   :  { %1836 = vsyncpa [#allocation5 + $0x1], 1 }

</bundles_post_ra>
